<compile_context>
chip_gen: v7x
topology: tpu7x:2x2x1
jax: 0.10.0
libtpu: 0.0.40
codegen_flags: <defaults>
</compile_context>

<pallas_src>
import jax
import jax.numpy as jnp
from jax.experimental import pallas as pl
from jax.experimental.pallas import tpu as pltpu

_LANE = 128
_BLOCK_ROWS = 2048                        # 2048 x 128 f32 = 1 MiB per buffer
_MIN_KERNEL_ELEMS = _BLOCK_ROWS * _LANE   # below this, plain XLA fusion wins


def _round_up(x: int, m: int) -> int:
    return -(-x // m) * m


def _kuka_kernel(dt_ref, state_ref, control_ref, out_ref):
    """out = state + control * dt — pure VPU elementwise on a lane-dense tile."""
    dt = dt_ref[0]                                    # f32 scalar from SMEM
    s = state_ref[...].astype(jnp.float32)
    c = control_ref[...].astype(jnp.float32)
    out_ref[...] = (s + c * dt).astype(out_ref.dtype)


def _euler_step_2d(s2d: jax.Array, c2d: jax.Array, dt_arr: jax.Array) -> jax.Array:
    """Run the kernel on a lane-dense (rows, 128) slab (rows need not divide the block)."""
    rows, lanes = s2d.shape
    assert lanes == _LANE
    block_rows = min(_BLOCK_ROWS, _round_up(rows, 8))
    grid = (pl.cdiv(rows, block_rows),)
    tile = pl.BlockSpec((block_rows, _LANE), lambda i: (i, 0))

    nbytes = s2d.size * s2d.dtype.itemsize
    return pl.pallas_call(
        _kuka_kernel,
        out_shape=jax.ShapeDtypeStruct(s2d.shape, s2d.dtype),
        grid=grid,
        in_specs=[
            pl.BlockSpec(memory_space=pltpu.MemorySpace.SMEM),  # dt (1,) scalar
            tile,                                               # state tile
            tile,                                               # control tile
        ],
        out_specs=tile,
        compiler_params=pltpu.CompilerParams(
            dimension_semantics=("parallel",),
        ),
        cost_estimate=pl.CostEstimate(
            flops=2 * s2d.size,
            transcendentals=0,
            bytes_accessed=3 * nbytes,
        ),
    )(dt_arr, s2d, c2d)


def _xla_step(state: jax.Array, control: jax.Array, dt) -> jax.Array:
    dt32 = jnp.float32(dt)
    return (state.astype(jnp.float32) + control.astype(jnp.float32) * dt32).astype(state.dtype)


def kuka_kinematics_forward(state: jax.Array, control: jax.Array, dt) -> jax.Array:
    assert state.shape == control.shape
    assert state.dtype == control.dtype

    orig_shape = state.shape
    total = int(state.size)

    # Tiny-input fast path: at/below one block the op is launch-overhead bound
    # and plain XLA fusion is strictly faster than a pallas_call.
    if total <= _MIN_KERNEL_ELEMS:
        return _xla_step(state, control, dt)

    dt_arr = jnp.asarray(dt, dtype=jnp.float32).reshape(1)
    rows, rem = divmod(total, _LANE)

    if rem == 0:
        # Zero-copy path: free reshape to a lane-dense slab; Pallas masks the
        # partial last row-block (rows need not be a multiple of block_rows).
        s2d = state.reshape(rows, _LANE)
        c2d = control.reshape(rows, _LANE)
        return _euler_step_2d(s2d, c2d, dt_arr).reshape(orig_shape)

    # Misaligned total: kernel processes the 128-aligned bulk, plain XLA
    # handles the <128-element tail, results are stitched back together.
    flat_s = state.reshape(-1)
    flat_c = control.reshape(-1)
    bulk = rows * _LANE
    bulk_out = _euler_step_2d(
        flat_s[:bulk].reshape(rows, _LANE),
        flat_c[:bulk].reshape(rows, _LANE),
        dt_arr,
    )
    tail_out = _xla_step(flat_s[bulk:], flat_c[bulk:], dt)
    return jnp.concatenate([bulk_out.reshape(-1), tail_out]).reshape(orig_shape)


if __name__ == "__main__":
    dt = 0.05
    key = jax.random.PRNGKey(0)
    k1, k2, k3, k4, k5, k6 = jax.random.split(key, 6)
    D = 7  # Kuka iiwa 7-DoF

    # 1) Module's native tiny shape -> XLA fast path.
    B0 = 2
    s0 = jax.random.normal(k1, (B0, D), dtype=jnp.float32)
    c0 = jax.random.normal(k2, (B0, D), dtype=jnp.float32)
    o0 = jax.block_until_ready(kuka_kinematics_forward(s0, c0, dt))
    assert o0.shape == s0.shape and o0.dtype == s0.dtype
    assert jnp.allclose(o0, s0 + c0 * dt, atol=1e-6), "mismatch (native)"

    # 2) Large 128-aligned total -> zero-copy kernel path, 2-block grid with a
    #    masked edge block (38400 * 7 = 268800 = 2100 * 128).
    B1 = 38400
    s1 = jax.random.normal(k3, (B1, D), dtype=jnp.float32)
    c1 = jax.random.normal(k4, (B1, D), dtype=jnp.float32)
    o1 = jax.block_until_ready(kuka_kinematics_forward(s1, c1, dt))
    assert o1.shape == s1.shape and o1.dtype == s1.dtype
    assert jnp.allclose(o1, s1 + c1 * dt, atol=1e-6), "mismatch (aligned)"

    # 3) Large misaligned total -> kernel bulk + XLA tail
    #    (40000 * 7 = 280000 = 2187 * 128 + 64).
    B2 = 40000
    s2 = jax.random.normal(k5, (B2, D), dtype=jnp.float32)
    c2 = jax.random.normal(k6, (B2, D), dtype=jnp.float32)
    o2 = jax.block_until_ready(kuka_kinematics_forward(s2, c2, dt))
    assert o2.shape == s2.shape and o2.dtype == s2.dtype
    assert jnp.allclose(o2, s2 + c2 * dt, atol=1e-6), "mismatch (misaligned)"

    print("KERNEL_OK")
</pallas_src>

<mosaic_0001>
module attributes {stable_mosaic.version = 11 : i64} {
  func.func @_kuka_kernel(%arg0: i32, %arg1: memref<1xf32, #tpu.memory_space<smem>>, %arg2: memref<2048x128xf32, #tpu.memory_space<vmem>>, %arg3: memref<2048x128xf32, #tpu.memory_space<vmem>>, %arg4: memref<2048x128xf32, #tpu.memory_space<vmem>>) attributes {dimension_semantics = [#tpu.dimension_semantics<parallel>], iteration_bounds = array<i64: 2>, scalar_prefetch = 0 : i64, scratch_operands = 0 : i64, tpu.core_type = #tpu.core_type<tc>, window_params = [{transform_indices = @transform_0, window_bounds = array<i64: 1>}, {transform_indices = @transform_1, window_bounds = array<i64: 2048, 128>}, {transform_indices = @transform_2, window_bounds = array<i64: 2048, 128>}, {transform_indices = @transform_3, window_bounds = array<i64: 2048, 128>}]} {
    %c0 = arith.constant 0 : index
    %0 = memref.load %arg1[%c0] : memref<1xf32, #tpu.memory_space<smem>>
    %c0_0 = arith.constant 0 : index
    %c0_1 = arith.constant 0 : index
    %1 = vector.load %arg2[%c0_0, %c0_1] : memref<2048x128xf32, #tpu.memory_space<vmem>>, vector<2048x128xf32>
    %c0_2 = arith.constant 0 : index
    %c0_3 = arith.constant 0 : index
    %2 = vector.load %arg3[%c0_2, %c0_3] : memref<2048x128xf32, #tpu.memory_space<vmem>>, vector<2048x128xf32>
    %3 = vector.broadcast %0 : f32 to vector<2048x128xf32>
    %4 = arith.mulf %2, %3 : vector<2048x128xf32>
    %5 = arith.addf %1, %4 : vector<2048x128xf32>
    %c0_4 = arith.constant 0 : index
    %c0_5 = arith.constant 0 : index
    %6 = vector.load %arg4[%c0_4, %c0_5] : memref<2048x128xf32, #tpu.memory_space<vmem>>, vector<2048x128xf32>
    tpu.vector_store %arg4[%c0_4, %c0_5], %5 {strides = array<i32>} : memref<2048x128xf32, #tpu.memory_space<vmem>>, vector<2048x128xf32>,
    return
  }
  func.func @transform_0(%arg0: i32) -> i32 {
    %c0_i32 = arith.constant 0 : i32
    %c0_i32_0 = arith.constant 0 : i32
    return %c0_i32 : i32
  }
  func.func @transform_1(%arg0: i32) -> (i32, i32) {
    %c0_i32 = arith.constant 0 : i32
    %c0_i32_0 = arith.constant 0 : i32
    return %arg0, %c0_i32 : i32, i32
  }
  func.func @transform_2(%arg0: i32) -> (i32, i32) {
    %c0_i32 = arith.constant 0 : i32
    %c0_i32_0 = arith.constant 0 : i32
    return %arg0, %c0_i32 : i32, i32
  }
  func.func @transform_3(%arg0: i32) -> (i32, i32) {
    %c0_i32 = arith.constant 0 : i32
    %c0_i32_0 = arith.constant 0 : i32
    return %arg0, %c0_i32 : i32, i32
  }
}

</mosaic_0001>

<bundles_post_ra>
// kernel: tpu_custom_call.1
= control target key start
LH: loop header
LB: loop body
LE: loop exit
PB: predicated region body
PF: predicated region fallthrough
CT: control target
= control target key end

     0   :  { %s3157_s0 = inlined_call_operand.<no memory space> [shape: f32[1], index: 0, kind: input, shape index: {}]   ;;  %s3158_s1 = inlined_call_operand.hbm [shape: f32[2100,128], index: 1, kind: input, shape index: {}]   ;;  %s3159_s2 = inlined_call_operand.hbm [shape: f32[2100,128], index: 2, kind: input, shape index: {}]   ;;  %s3160_s3 = inlined_call_operand.hbm [shape: f32[2100,128], index: 3, kind: output, shape index: {}]  }
   0x1   :  { %8 = sst [smem:[#allocation2]] %s3157_s0 }
   0x2   :  { %9 = vsyncpa [#allocation4], 0 }
   0x3   :  { %11 = vsyncpa [#allocation4 + $0x1], 0 }
   0x4   :  { %12 = vsyncpa [#allocation7], 0 }
   0x5   :  { %14 = vsyncpa [#allocation7 + $0x1], 0 }
   0x6   :  { %15 = vsyncpa [#allocation5], 0 }
   0x7   :  { %17 = vsyncpa [#allocation5 + $0x1], 0  ;;  %s1894_s14 = smov 0   ;;  %s1896_s15 = smov 0  }
   0x8   :  { %s1898_s16 = smov 0   ;;  %s1900_s17 = smov 0  }
   0x9 LB: > { %s1915_s0 = sadd.s32 4294967295, %s1860_s17   ;;  %s1655_s18 = sadd.s32 4294967294, %s1860_s17   ;;  %s1860_s17 = sphi %s1900_s17, %s3172_s17   ;;  %s1856_s16 = sphi %s1898_s16, %s3171_s16   ;;  %s1852_s15 = sphi %s1896_s15, %s3170_s15   ;;  %s1848_s14 = sphi %s1894_s14, %s3169_s14  }
   0xa   : > { %s1919_s19 = sadd.s32 1, %s1860_s17   ;;  %s51_s20 = sadd.s32 1, %s1856_s16 }
   0xb   : > { %s48_s21 = ssub.s32 %s1860_s17, %s1919_s19  ;;  %p58_p0 = scmp.ne.s32.totalorder %s1856_s16, %s1852_s15 }
   0xc   : > { %p49_p1 = scmp.eq.s32.totalorder %s48_s21, 0  ;;  %p59_p2 = scmp.eq.s32.totalorder %s1860_s17, 0 }
   0xd   : > { %p64_p3 = scmp.ne.s32.totalorder %s1852_s15, %s1848_s14  ;;  %p65_p4 = scmp.eq.s32.totalorder %s1915_s0, 0 }
   0xe   : > { %s1931_s22 = scalar_select %p49_p1, %s1856_s16, %s51_s20  }
   0xf   : > { %p1933_p5 = por %p59_p2, %p58_p0  ;;  %p1937_p6 = por %p65_p4, %p64_p3 }
  0x10   : > { %p114_p7 = scmp.eq.s32.totalorder %s1915_s0, 1  ;;  %p120_p8 = scmp.eq.s32.totalorder %s1655_s18, 1 }
  0x11   : > { %p3161_p11 = scmp.ge.s32.totalorder %s1860_s17, 2 }
  0x12   : > { %p1942_p9 = por %p114_p7, %p58_p0  ;;  %p1946_p10 = por %p120_p8, %p64_p3 }
  0x13   : > { %139 = sbr.rel (%p3161_p11) target bundleno = 96 (0x60), region = 20 }
  0x14   : > { %s3164_s25 = scalar_select %p1942_p9, 1, 0 }
  0x15   : > { %s3165_s26 = scalar_select %p1946_p10, 1, 0 }
  0x1a   : > { %142 = sbr.rel (!%p1933_p5) target bundleno = 61 (0x3d), region = 24  ;;  %s143_s27 = sand.u32 (%p1933_p5), 1, %s1856_s16  }
  0x1b   : > { %s1659_s28 = sshll.u32 (%p1933_p5), %s1860_s17, 8  ;;  %s1658_s29 = sshll.u32 (%p1933_p5), %s143_s27, 11 }
  0x1c   : > { %s149_s30 = ssub.s32 (%p1933_p5), 263, %s1659_s28  ;;  %s1960_s6 = scalar_lea.sflag (%p1933_p5), [#allocation4], %s143_s27 }
  0x1d   : > { %p150_p12 = scmp.lt.s32.totalorder (%p1933_p5), %s149_s30, 256  ;;  %s147_s7 = scalar_lea.vmem (%p1933_p5), [#allocation3], %s1658_s29 }
  0x21   : > { %s3174_s30 = smov (!%p150_p12, %s149_s30), 256 }
  0x22   : > { %s1957_s4 = sshll.u32 %s3174_s30, 7 }
  0x23   : > { %s154_s5 = ssub.s32 32768, %s1957_s4 }
  0x24   : > { %155 = vsyncadd %s1960_s6, %s154_s5  ;;  %p1661_p13 = scmp.ne.s32.totalorder %s1957_s4, 0  ;;  %s1685_s8 = sshll.u32 %s1860_s17, 15 }
  0x25   : > { %s1968_s11 = scalar_lea.hbm %s3158_s1, %s1685_s8  ;;  %s160_s12 = sshll.u32 %s147_s7, 4  ;;  %s1970_s12 = int_to_ptr.vmem [resolvable:$true] %s160_s12 }
  0x26   : > { %s1734_s13 = scalar_lea.hbm %s1968_s11, %s1957_s4  ;;  %s1738_s21 = scalar_lea.hbm %s3158_s1, 33664 }
  0x27   : > { %p1735_p0 = scmp.ne.s32.totalorder %s1968_s11, %s1734_s13  ;;  %p1739_p3 = scmp.lt.u32.totalorder %s1968_s11, %s3158_s1 }
  0x28   : > { %p1740_p4 = scmp.lt.u32.totalorder %s1738_s21, %s1734_s13  ;;  %p1742_p8 = scmp.lt.u32.totalorder %s1734_s13, %s1968_s11 }
  0x29   : > { %p1736_p1 = pnand %p1735_p0, %p1661_p13 }
  0x2a   : > { %p1741_p7 = por %p1740_p4, %p1739_p3 }
  0x2b   : > { %p1737_p2 = pneg %p1736_p1 }
  0x2c   : > { %p1743_p12 = por %p1742_p8, %p1741_p7 }
  0x2e   : > { %p1744_p11 = pnand %p1743_p12, %p1737_p2 }
  0x30   : > { %1747 = shalt.err (!%p1744_p11)
}
  0x31   : > { %s1748_s29 = scalar_lea.vmem %s1970_s12, %s1957_s4  ;;  %s1862_s30 = smov [#allocation3]  }
  0x32   : > { %p1749_p0 = scmp.ne.s32.totalorder %s1970_s12, %s1748_s29  ;;  %s1752_s5 = sshll.u32 %s1862_s30, 4  ;;  %s1753_s5 = int_to_ptr.vmem [resolvable:$false] %s1752_s5 }
  0x33   : > { %s1754_s7 = scalar_lea.vmem %s1753_s5, 65536  ;;  %p1755_p9 = scmp.lt.s32.totalorder %s1970_s12, %s1753_s5 }
  0x34   : > { %p1750_p1 = pnand %p1749_p0, %p1661_p13  ;;  %p1756_p3 = scmp.lt.s32.totalorder %s1754_s7, %s1748_s29 }
  0x36   : > { %p1751_p10 = pneg %p1750_p1  ;;  %p1757_p4 = por %p1756_p3, %p1755_p9 }
  0x38   : > { %p1758_p7 = pnand %p1757_p4, %p1751_p10 }
  0x3a   : > { %1761 = shalt.err (!%p1758_p7)
}
  0x3b   : > { %s1863_s8 = smov 128   ;;  %s1864_s9 = smov 8  }
  0x3c   : > { %166 = dma.hbm_to_vmem [thread:$0]  (%p1661_p13), %s1968_s11, %s1957_s4, %s1970_s12, %s1960_s6, %s1863_s8, %s1863_s8, %s1864_s9  }
  0x3d PF: > { %169 = sbr.rel (!%p1933_p5) target bundleno = 96 (0x60), region = 28  ;;  %s170_s10 = sand.u32 (%p1933_p5), 1, %s1856_s16  }
  0x3e   : > { %s1666_s13 = sshll.u32 (%p1933_p5), %s1860_s17, 8  ;;  %s1665_s18 = sshll.u32 (%p1933_p5), %s170_s10, 11 }
  0x3f   : > { %s176_s20 = ssub.s32 (%p1933_p5), 263, %s1666_s13  ;;  %s2004_s28 = scalar_lea.sflag (%p1933_p5), [#allocation7], %s170_s10 }
  0x40   : > { %p177_p9 = scmp.lt.s32.totalorder (%p1933_p5), %s176_s20, 256  ;;  %s174_s4 = scalar_lea.vmem (%p1933_p5), [#allocation6], %s1665_s18 }
  0x44   : > { %s3176_s20 = smov (!%p177_p9, %s176_s20), 256 }
  0x45   : > { %s2001_s21 = sshll.u32 %s3176_s20, 7 }
  0x46   : > { %s181_s27 = ssub.s32 32768, %s2001_s21 }
  0x47   : > { %182 = vsyncadd %s2004_s28, %s181_s27  ;;  %p1668_p5 = scmp.ne.s32.totalorder %s2001_s21, 0  ;;  %s1686_s23 = sshll.u32 %s1860_s17, 15 }
  0x48   : > { %s2012_s12 = scalar_lea.hbm %s3159_s2, %s1686_s23  ;;  %s187_s29 = sshll.u32 %s174_s4, 4  ;;  %s2014_s29 = int_to_ptr.vmem [resolvable:$true] %s187_s29 }
  0x49   : > { %s1762_s30 = scalar_lea.hbm %s2012_s12, %s2001_s21  ;;  %s1766_s8 = scalar_lea.hbm %s3159_s2, 33664 }
  0x4a   : > { %p1763_p10 = scmp.ne.s32.totalorder %s2012_s12, %s1762_s30  ;;  %p1767_p2 = scmp.lt.u32.totalorder %s2012_s12, %s3159_s2 }
  0x4b   : > { %p1768_p8 = scmp.lt.u32.totalorder %s1766_s8, %s1762_s30  ;;  %p1770_p0 = scmp.lt.u32.totalorder %s1762_s30, %s2012_s12 }
  0x4c   : > { %p1764_p11 = pnand %p1763_p10, %p1668_p5 }
  0x4d   : > { %p1769_p12 = por %p1768_p8, %p1767_p2 }
  0x4e   : > { %p1765_p13 = pneg %p1764_p11 }
  0x4f   : > { %p1771_p1 = por %p1770_p0, %p1769_p12 }
  0x51   : > { %p1772_p3 = pnand %p1771_p1, %p1765_p13 }
  0x53   : > { %1775 = shalt.err (!%p1772_p3)
}
  0x54   : > { %s1776_s13 = scalar_lea.vmem %s2014_s29, %s2001_s21  ;;  %s1865_s18 = smov [#allocation6]  }
  0x55   : > { %p1777_p4 = scmp.ne.s32.totalorder %s2014_s29, %s1776_s13  ;;  %s1780_s20 = sshll.u32 %s1865_s18, 4  ;;  %s1781_s20 = int_to_ptr.vmem [resolvable:$false] %s1780_s20 }
  0x56   : > { %s1782_s27 = scalar_lea.vmem %s1781_s20, 65536  ;;  %p1783_p10 = scmp.lt.s32.totalorder %s2014_s29, %s1781_s20 }
  0x57   : > { %p1778_p7 = pnand %p1777_p4, %p1668_p5  ;;  %p1784_p11 = scmp.lt.s32.totalorder %s1782_s27, %s1776_s13 }
  0x59   : > { %p1779_p9 = pneg %p1778_p7  ;;  %p1785_p2 = por %p1784_p11, %p1783_p10 }
  0x5b   : > { %p1786_p8 = pnand %p1785_p2, %p1779_p9 }
  0x5d   : > { %1789 = shalt.err (!%p1786_p8)
}
  0x5e   : > { %s1866_s4 = smov 128   ;;  %s1867_s23 = smov 8  }
  0x5f   : > { %193 = dma.hbm_to_vmem [thread:$0]  (%p1668_p5), %s2012_s12, %s2001_s21, %s2014_s29, %s2004_s28, %s1866_s4, %s1866_s4, %s1867_s23  }
  0x60 PF: > { %p1672_p13 = scmp.ge.s32.totalorder %s1860_s17, 1  ;;  %p195_p12 = scmp.lt.s32.totalorder %s1860_s17, 3 }
  0x62   : > { %p196_p0 = pnand %p1672_p13, %p195_p12 }
  0x63   : > { %s2044_s6 = sand.u32 (!%p196_p0), 1, %s1852_s15  }
  0x64   : > { %199 = sbr.rel (%p196_p0) target bundleno = 337 (0x151), region = 32  ;;  %s2047_s11 = sshll.u32 (!%p196_p0), %s2044_s6, 11 }
  0x65   : > { %s202_s30 = scalar_lea.sflag (!%p196_p0), [#allocation4], %s2044_s6  ;;  %s2051_s5 = scalar_lea.vmem (!%p196_p0), [#allocation3], %s2047_s11 }
  0x6b   : > { %1835 = dma.done.wait (%p1937_p6), %s202_s30, 32768  }
  0x6c   : > { %1837 = vsyncadd (%p1937_p6), %s202_s30, 4294934528  ;;  %s211_s21 = scalar_lea.sflag [#allocation7], %s2044_s6  ;;  %s2059_s28 = scalar_lea.vmem [#allocation6], %s2047_s11 }
  0x6d   : > { %1839 = dma.done.wait (%p1937_p6), %s211_s21, 32768  }
  0x6e   : > { %1841 = vsyncadd (%p1937_p6), %s211_s21, 4294934528  ;;  %s257_s12 = sld [smem:[#allocation2]]  ;;  %v258_v0 = vld [vmem:[%s2051_s5] sm:$0xff]  ;;  %v259_v3 = vld [vmem:[%s2051_s5 + $0x8] sm:$0xff]  ;;  %s2089_s24 = scalar_lea.vmem [#allocation8], %s2047_s11 }
  0x6f   : > { %v514_v1 = vld [vmem:[%s2059_s28] sm:$0xff]  ;;  %v515_v5 = vld [vmem:[%s2059_s28 + $0x8] sm:$0xff]  ;;  %v260_v6 = vld [vmem:[%s2051_s5 + $0x10] sm:$0xff]  ;;  %s1540_s29 = scalar_lea.sflag [#allocation5], %s2044_s6  ;;  %p3166_p6 = scmp.ne.s32.totalorder %s3164_s25, 0 }
  0x70   : > { %v516_v7 = vld [vmem:[%s2059_s28 + $0x10] sm:$0xff]  ;;  %v261_v10 = vld [vmem:[%s2051_s5 + $0x18] sm:$0xff]  ;;  %v262_v12 = vld [vmem:[%s2051_s5 + $0x20] sm:$0xff]  ;;  %s1677_s7 = sshll.u32 (%p3166_p6), %s1915_s0, 8 }
  0x71   : > { %v517_v11 = vld [vmem:[%s2059_s28 + $0x18] sm:$0xff]  ;;  %v518_v15 = vld [vmem:[%s2059_s28 + $0x20] sm:$0xff]  ;;  %v263_v16 = vld [vmem:[%s2051_s5 + $0x28] sm:$0xff]  ;;  %s1548_s8 = ssub.s32 (%p3166_p6), 263, %s1677_s7 }
  0x72   : > { %v519_v17 = vld [vmem:[%s2059_s28 + $0x28] sm:$0xff]  ;;  %v264_v22 = vld [vmem:[%s2051_s5 + $0x30] sm:$0xff]  ;;  %v265_v24 = vld [vmem:[%s2051_s5 + $0x38] sm:$0xff]  ;;  %p1549_p5 = scmp.lt.s32.totalorder (%p3166_p6), %s1548_s8, 256 }
  0x73   : > { %v520_v23 = vld [vmem:[%s2059_s28 + $0x30] sm:$0xff]  ;;  %v521_v27 = vld [vmem:[%s2059_s28 + $0x38] sm:$0xff]  ;;  %v266_v28 = vld [vmem:[%s2051_s5 + $0x40] sm:$0xff] }
  0x74   : > { %v2067_v2 = vstv %s257_s12  ;;  %v522_v29 = vld [vmem:[%s2059_s28 + $0x40] sm:$0xff]  ;;  %v267_v34 = vld [vmem:[%s2051_s5 + $0x48] sm:$0xff]  ;;  %v268_v36 = vld [vmem:[%s2051_s5 + $0x50] sm:$0xff] }
  0x75   : > { %v771_v4 = vmul.f32 %v2067_v2, %v514_v1  ;;  %v772_v8 = vmul.f32 %v2067_v2, %v515_v5  ;;  %v773_v9 = vmul.f32 %v2067_v2, %v516_v7  ;;  %v774_v14 = vmul.f32 %v2067_v2, %v517_v11  ;;  %v523_v35 = vld [vmem:[%s2059_s28 + $0x48] sm:$0xff]  ;;  %v524_v39 = vld [vmem:[%s2059_s28 + $0x50] sm:$0xff]  ;;  %v269_v40 = vld [vmem:[%s2051_s5 + $0x58] sm:$0xff] }
  0x76   : > { %v775_v20 = vmul.f32 %v2067_v2, %v518_v15  ;;  %v776_v21 = vmul.f32 %v2067_v2, %v519_v17  ;;  %v777_v26 = vmul.f32 %v2067_v2, %v520_v23  ;;  %v778_v32 = vmul.f32 %v2067_v2, %v521_v27  ;;  %v525_v41 = vld [vmem:[%s2059_s28 + $0x58] sm:$0xff]  ;;  %v270_v46 = vld [vmem:[%s2051_s5 + $0x60] sm:$0xff]  ;;  %v271_v48 = vld [vmem:[%s2051_s5 + $0x68] sm:$0xff] }
  0x77   : > { %v1027_v13 = vadd.f32 %v771_v4, %v258_v0  ;;  %v1028_v18 = vadd.f32 %v772_v8, %v259_v3  ;;  %v1029_v19 = vadd.f32 %v773_v9, %v260_v6  ;;  %v1030_v25 = vadd.f32 %v774_v14, %v261_v10  ;;  %v526_v47 = vld [vmem:[%s2059_s28 + $0x60] sm:$0xff]  ;;  %v527_v51 = vld [vmem:[%s2059_s28 + $0x68] sm:$0xff]  ;;  %v272_v52 = vld [vmem:[%s2051_s5 + $0x70] sm:$0xff] }
  0x78   : > { %v1031_v30 = vadd.f32 %v775_v20, %v262_v12  ;;  %v1032_v31 = vadd.f32 %v776_v21, %v263_v16  ;;  %v779_v33 = vmul.f32 %v2067_v2, %v522_v29  ;;  %v1033_v37 = vadd.f32 %v777_v26, %v264_v22  ;;  %v528_v53 = vld [vmem:[%s2059_s28 + $0x70] sm:$0xff]  ;;  %v273_v58 = vld [vmem:[%s2051_s5 + $0x78] sm:$0xff]  ;;  %v274_v60 = vld [vmem:[%s2051_s5 + $0x80] sm:$0xff] }
  0x79   : > { %1283 = vst [vmem:[%s2089_s24] sm:$0xff] %v1027_v13  ;;  %1284 = vst [vmem:[%s2089_s24 + $0x8] sm:$0xff] %v1028_v18  ;;  %v780_v38 = vmul.f32 %v2067_v2, %v523_v35  ;;  %v1034_v42 = vadd.f32 %v778_v32, %v265_v24  ;;  %v781_v44 = vmul.f32 %v2067_v2, %v524_v39  ;;  %v529_v59 = vld [vmem:[%s2059_s28 + $0x78] sm:$0xff]  ;;  %v530_v63 = vld [vmem:[%s2059_s28 + $0x80] sm:$0xff] }
  0x7a   : > { %1285 = vst [vmem:[%s2089_s24 + $0x10] sm:$0xff] %v1029_v19  ;;  %1286 = vst [vmem:[%s2089_s24 + $0x18] sm:$0xff] %v1030_v25  ;;  %v1035_v43 = vadd.f32 %v779_v33, %v266_v28  ;;  %v782_v45 = vmul.f32 %v2067_v2, %v525_v41  ;;  %v783_v50 = vmul.f32 %v2067_v2, %v526_v47  ;;  %v275_v0 = vld [vmem:[%s2051_s5 + $0x88] sm:$0xff]  ;;  %v276_v7 = vld [vmem:[%s2051_s5 + $0x90] sm:$0xff] }
  0x7b   : > { %1287 = vst [vmem:[%s2089_s24 + $0x20] sm:$0xff] %v1031_v30  ;;  %1288 = vst [vmem:[%s2089_s24 + $0x28] sm:$0xff] %v1032_v31  ;;  %v1036_v49 = vadd.f32 %v780_v38, %v267_v34  ;;  %v1037_v54 = vadd.f32 %v781_v44, %v268_v36  ;;  %v784_v56 = vmul.f32 %v2067_v2, %v527_v51  ;;  %v531_v1 = vld [vmem:[%s2059_s28 + $0x88] sm:$0xff]  ;;  %v532_v8 = vld [vmem:[%s2059_s28 + $0x90] sm:$0xff] }
  0x7c   : > { %1289 = vst [vmem:[%s2089_s24 + $0x30] sm:$0xff] %v1033_v37  ;;  %1290 = vst [vmem:[%s2089_s24 + $0x38] sm:$0xff] %v1034_v42  ;;  %v1038_v55 = vadd.f32 %v782_v45, %v269_v40  ;;  %v785_v57 = vmul.f32 %v2067_v2, %v528_v53  ;;  %v1039_v61 = vadd.f32 %v783_v50, %v270_v46  ;;  %v277_v9 = vld [vmem:[%s2051_s5 + $0x98] sm:$0xff]  ;;  %v278_v13 = vld [vmem:[%s2051_s5 + $0xa0] sm:$0xff] }
  0x7d   : > { %1291 = vst [vmem:[%s2089_s24 + $0x40] sm:$0xff] %v1035_v43  ;;  %1292 = vst [vmem:[%s2089_s24 + $0x48] sm:$0xff] %v1036_v49  ;;  %v786_v62 = vmul.f32 %v2067_v2, %v529_v59  ;;  %v1040_v3 = vadd.f32 %v784_v56, %v271_v48  ;;  %v787_v5 = vmul.f32 %v2067_v2, %v530_v63  ;;  %v533_v12 = vld [vmem:[%s2059_s28 + $0x98] sm:$0xff]  ;;  %v534_v14 = vld [vmem:[%s2059_s28 + $0xa0] sm:$0xff] }
  0x7e   : > { %1293 = vst [vmem:[%s2089_s24 + $0x50] sm:$0xff] %v1037_v54  ;;  %1294 = vst [vmem:[%s2089_s24 + $0x58] sm:$0xff] %v1038_v55  ;;  %v1041_v4 = vadd.f32 %v785_v57, %v272_v52  ;;  %v788_v6 = vmul.f32 %v2067_v2, %v531_v1  ;;  %v789_v11 = vmul.f32 %v2067_v2, %v532_v8  ;;  %v279_v19 = vld [vmem:[%s2051_s5 + $0xa8] sm:$0xff]  ;;  %v280_v21 = vld [vmem:[%s2051_s5 + $0xb0] sm:$0xff] }
  0x7f   : > { %1295 = vst [vmem:[%s2089_s24 + $0x60] sm:$0xff] %v1039_v61  ;;  %v1042_v10 = vadd.f32 %v786_v62, %v273_v58  ;;  %1296 = vst [vmem:[%s2089_s24 + $0x68] sm:$0xff] %v1040_v3  ;;  %v1043_v15 = vadd.f32 %v787_v5, %v274_v60  ;;  %v790_v17 = vmul.f32 %v2067_v2, %v533_v12  ;;  %v535_v20 = vld [vmem:[%s2059_s28 + $0xa8] sm:$0xff]  ;;  %v536_v24 = vld [vmem:[%s2059_s28 + $0xb0] sm:$0xff] }
  0x80   : > { %1297 = vst [vmem:[%s2089_s24 + $0x70] sm:$0xff] %v1041_v4  ;;  %v1044_v16 = vadd.f32 %v788_v6, %v275_v0  ;;  %v791_v18 = vmul.f32 %v2067_v2, %v534_v14  ;;  %v1045_v22 = vadd.f32 %v789_v11, %v276_v7  ;;  %v792_v23 = vmul.f32 %v2067_v2, %v535_v20  ;;  %v281_v25 = vld [vmem:[%s2051_s5 + $0xb8] sm:$0xff]  ;;  %v282_v31 = vld [vmem:[%s2051_s5 + $0xc0] sm:$0xff]  ;;  %v283_v33 = vld [vmem:[%s2051_s5 + $0xc8] sm:$0xff] }
  0x81   : > { %1298 = vst [vmem:[%s2089_s24 + $0x78] sm:$0xff] %v1042_v10  ;;  %v537_v26 = vld [vmem:[%s2059_s28 + $0xb8] sm:$0xff]  ;;  %1299 = vst [vmem:[%s2089_s24 + $0x80] sm:$0xff] %v1043_v15  ;;  %v1046_v27 = vadd.f32 %v790_v17, %v277_v9  ;;  %v793_v29 = vmul.f32 %v2067_v2, %v536_v24  ;;  %v538_v32 = vld [vmem:[%s2059_s28 + $0xc0] sm:$0xff] }
  0x82   : > { %1300 = vst [vmem:[%s2089_s24 + $0x88] sm:$0xff] %v1044_v16  ;;  %v1047_v28 = vadd.f32 %v791_v18, %v278_v13  ;;  %v794_v30 = vmul.f32 %v2067_v2, %v537_v26  ;;  %1301 = vst [vmem:[%s2089_s24 + $0x90] sm:$0xff] %v1045_v22  ;;  %v1048_v34 = vadd.f32 %v792_v23, %v279_v19  ;;  %v539_v36 = vld [vmem:[%s2059_s28 + $0xc8] sm:$0xff]  ;;  %v284_v37 = vld [vmem:[%s2051_s5 + $0xd0] sm:$0xff] }
  0x83   : > { %v795_v35 = vmul.f32 %v2067_v2, %v538_v32  ;;  %v540_v38 = vld [vmem:[%s2059_s28 + $0xd0] sm:$0xff]  ;;  %1302 = vst [vmem:[%s2089_s24 + $0x98] sm:$0xff] %v1046_v27  ;;  %v1049_v39 = vadd.f32 %v793_v29, %v280_v21  ;;  %v796_v41 = vmul.f32 %v2067_v2, %v539_v36  ;;  %v285_v43 = vld [vmem:[%s2051_s5 + $0xd8] sm:$0xff]  ;;  %v286_v45 = vld [vmem:[%s2051_s5 + $0xe0] sm:$0xff] }
  0x84   : > { %1303 = vst [vmem:[%s2089_s24 + $0xa0] sm:$0xff] %v1047_v28  ;;  %v1050_v40 = vadd.f32 %v794_v30, %v281_v25  ;;  %v797_v42 = vmul.f32 %v2067_v2, %v540_v38  ;;  %v541_v44 = vld [vmem:[%s2059_s28 + $0xd8] sm:$0xff]  ;;  %1304 = vst [vmem:[%s2089_s24 + $0xa8] sm:$0xff] %v1048_v34  ;;  %v542_v48 = vld [vmem:[%s2059_s28 + $0xe0] sm:$0xff] }
  0x85   : > { %v1051_v46 = vadd.f32 %v795_v35, %v282_v31  ;;  %v798_v47 = vmul.f32 %v2067_v2, %v541_v44  ;;  %v287_v49 = vld [vmem:[%s2051_s5 + $0xe8] sm:$0xff]  ;;  %1305 = vst [vmem:[%s2089_s24 + $0xb0] sm:$0xff] %v1049_v39  ;;  %v1052_v51 = vadd.f32 %v796_v41, %v283_v33  ;;  %v799_v53 = vmul.f32 %v2067_v2, %v542_v48  ;;  %v288_v55 = vld [vmem:[%s2051_s5 + $0xf0] sm:$0xff]  ;;  %v289_v57 = vld [vmem:[%s2051_s5 + $0xf8] sm:$0xff] }
  0x86   : > { %v543_v50 = vld [vmem:[%s2059_s28 + $0xe8] sm:$0xff]  ;;  %1306 = vst [vmem:[%s2089_s24 + $0xb8] sm:$0xff] %v1050_v40  ;;  %v1053_v52 = vadd.f32 %v797_v42, %v284_v37  ;;  %v544_v56 = vld [vmem:[%s2059_s28 + $0xf0] sm:$0xff]  ;;  %v545_v60 = vld [vmem:[%s2059_s28 + $0xf8] sm:$0xff] }
  0x87   : > { %v800_v54 = vmul.f32 %v2067_v2, %v543_v50  ;;  %1307 = vst [vmem:[%s2089_s24 + $0xc0] sm:$0xff] %v1051_v46  ;;  %v1054_v58 = vadd.f32 %v798_v47, %v285_v43  ;;  %v801_v59 = vmul.f32 %v2067_v2, %v544_v56  ;;  %v290_v61 = vld [vmem:[%s2051_s5 + $0x100] sm:$0xff]  ;;  %1308 = vst [vmem:[%s2089_s24 + $0xc8] sm:$0xff] %v1052_v51  ;;  %v291_v4 = vld [vmem:[%s2051_s5 + $0x108] sm:$0xff] }
  0x88   : > { %v546_v62 = vld [vmem:[%s2059_s28 + $0x100] sm:$0xff]  ;;  %1309 = vst [vmem:[%s2089_s24 + $0xd0] sm:$0xff] %v1053_v52  ;;  %v1055_v63 = vadd.f32 %v799_v53, %v286_v45  ;;  %v802_v1 = vmul.f32 %v2067_v2, %v545_v60  ;;  %v547_v5 = vld [vmem:[%s2059_s28 + $0x108] sm:$0xff]  ;;  %v292_v6 = vld [vmem:[%s2051_s5 + $0x110] sm:$0xff] }
  0x89   : > { %v1056_v0 = vadd.f32 %v800_v54, %v287_v49  ;;  %v803_v3 = vmul.f32 %v2067_v2, %v546_v62  ;;  %1310 = vst [vmem:[%s2089_s24 + $0xd8] sm:$0xff] %v1054_v58  ;;  %v1057_v7 = vadd.f32 %v801_v59, %v288_v55  ;;  %v804_v8 = vmul.f32 %v2067_v2, %v547_v5  ;;  %v548_v9 = vld [vmem:[%s2059_s28 + $0x110] sm:$0xff]  ;;  %v293_v10 = vld [vmem:[%s2051_s5 + $0x118] sm:$0xff]  ;;  %v294_v16 = vld [vmem:[%s2051_s5 + $0x120] sm:$0xff] }
  0x8a   : > { %v549_v11 = vld [vmem:[%s2059_s28 + $0x118] sm:$0xff]  ;;  %1311 = vst [vmem:[%s2089_s24 + $0xe0] sm:$0xff] %v1055_v63  ;;  %v1058_v12 = vadd.f32 %v802_v1, %v289_v57  ;;  %v805_v14 = vmul.f32 %v2067_v2, %v548_v9  ;;  %v550_v17 = vld [vmem:[%s2059_s28 + $0x120] sm:$0xff]  ;;  %v295_v18 = vld [vmem:[%s2051_s5 + $0x128] sm:$0xff] }
  0x8b   : > { %1312 = vst [vmem:[%s2089_s24 + $0xe8] sm:$0xff] %v1056_v0  ;;  %v1059_v13 = vadd.f32 %v803_v3, %v290_v61  ;;  %v806_v15 = vmul.f32 %v2067_v2, %v549_v11  ;;  %1313 = vst [vmem:[%s2089_s24 + $0xf0] sm:$0xff] %v1057_v7  ;;  %v1060_v19 = vadd.f32 %v804_v8, %v291_v4  ;;  %v551_v21 = vld [vmem:[%s2059_s28 + $0x128] sm:$0xff]  ;;  %v296_v22 = vld [vmem:[%s2051_s5 + $0x130] sm:$0xff] }
  0x8c   : > { %v807_v20 = vmul.f32 %v2067_v2, %v550_v17  ;;  %v552_v23 = vld [vmem:[%s2059_s28 + $0x130] sm:$0xff]  ;;  %1314 = vst [vmem:[%s2089_s24 + $0xf8] sm:$0xff] %v1058_v12  ;;  %v1061_v24 = vadd.f32 %v805_v14, %v292_v6  ;;  %v808_v26 = vmul.f32 %v2067_v2, %v551_v21  ;;  %v297_v28 = vld [vmem:[%s2051_s5 + $0x138] sm:$0xff]  ;;  %v298_v30 = vld [vmem:[%s2051_s5 + $0x140] sm:$0xff] }
  0x8d   : > { %1315 = vst [vmem:[%s2089_s24 + $0x100] sm:$0xff] %v1059_v13  ;;  %v1062_v25 = vadd.f32 %v806_v15, %v293_v10  ;;  %v809_v27 = vmul.f32 %v2067_v2, %v552_v23  ;;  %v553_v29 = vld [vmem:[%s2059_s28 + $0x138] sm:$0xff]  ;;  %1316 = vst [vmem:[%s2089_s24 + $0x108] sm:$0xff] %v1060_v19  ;;  %v554_v33 = vld [vmem:[%s2059_s28 + $0x140] sm:$0xff] }
  0x8e   : > { %v1063_v31 = vadd.f32 %v807_v20, %v294_v16  ;;  %v810_v32 = vmul.f32 %v2067_v2, %v553_v29  ;;  %v299_v34 = vld [vmem:[%s2051_s5 + $0x148] sm:$0xff]  ;;  %1317 = vst [vmem:[%s2089_s24 + $0x110] sm:$0xff] %v1061_v24  ;;  %v1064_v36 = vadd.f32 %v808_v26, %v295_v18  ;;  %v811_v38 = vmul.f32 %v2067_v2, %v554_v33  ;;  %v300_v40 = vld [vmem:[%s2051_s5 + $0x150] sm:$0xff]  ;;  %v301_v42 = vld [vmem:[%s2051_s5 + $0x158] sm:$0xff] }
  0x8f   : > { %v555_v35 = vld [vmem:[%s2059_s28 + $0x148] sm:$0xff]  ;;  %1318 = vst [vmem:[%s2089_s24 + $0x118] sm:$0xff] %v1062_v25  ;;  %v1065_v37 = vadd.f32 %v809_v27, %v296_v22  ;;  %v556_v41 = vld [vmem:[%s2059_s28 + $0x150] sm:$0xff]  ;;  %v557_v45 = vld [vmem:[%s2059_s28 + $0x158] sm:$0xff] }
  0x90   : > { %v812_v39 = vmul.f32 %v2067_v2, %v555_v35  ;;  %1319 = vst [vmem:[%s2089_s24 + $0x120] sm:$0xff] %v1063_v31  ;;  %v1066_v43 = vadd.f32 %v810_v32, %v297_v28  ;;  %v813_v44 = vmul.f32 %v2067_v2, %v556_v41  ;;  %v302_v46 = vld [vmem:[%s2051_s5 + $0x160] sm:$0xff]  ;;  %1320 = vst [vmem:[%s2089_s24 + $0x128] sm:$0xff] %v1064_v36  ;;  %v303_v52 = vld [vmem:[%s2051_s5 + $0x168] sm:$0xff] }
  0x91   : > { %v558_v47 = vld [vmem:[%s2059_s28 + $0x160] sm:$0xff]  ;;  %1321 = vst [vmem:[%s2089_s24 + $0x130] sm:$0xff] %v1065_v37  ;;  %v1067_v48 = vadd.f32 %v811_v38, %v298_v30  ;;  %v814_v50 = vmul.f32 %v2067_v2, %v557_v45  ;;  %v559_v53 = vld [vmem:[%s2059_s28 + $0x168] sm:$0xff]  ;;  %v304_v54 = vld [vmem:[%s2051_s5 + $0x170] sm:$0xff] }
  0x92   : > { %v1068_v49 = vadd.f32 %v812_v39, %v299_v34  ;;  %v815_v51 = vmul.f32 %v2067_v2, %v558_v47  ;;  %1322 = vst [vmem:[%s2089_s24 + $0x138] sm:$0xff] %v1066_v43  ;;  %v1069_v55 = vadd.f32 %v813_v44, %v300_v40  ;;  %v816_v56 = vmul.f32 %v2067_v2, %v559_v53  ;;  %v560_v57 = vld [vmem:[%s2059_s28 + $0x170] sm:$0xff]  ;;  %v305_v58 = vld [vmem:[%s2051_s5 + $0x178] sm:$0xff]  ;;  %v306_v0 = vld [vmem:[%s2051_s5 + $0x180] sm:$0xff] }
  0x93   : > { %v561_v59 = vld [vmem:[%s2059_s28 + $0x178] sm:$0xff]  ;;  %1323 = vst [vmem:[%s2089_s24 + $0x140] sm:$0xff] %v1067_v48  ;;  %v1070_v60 = vadd.f32 %v814_v50, %v301_v42  ;;  %v817_v62 = vmul.f32 %v2067_v2, %v560_v57  ;;  %v562_v1 = vld [vmem:[%s2059_s28 + $0x180] sm:$0xff]  ;;  %v307_v3 = vld [vmem:[%s2051_s5 + $0x188] sm:$0xff] }
  0x94   : > { %1324 = vst [vmem:[%s2089_s24 + $0x148] sm:$0xff] %v1068_v49  ;;  %v1071_v61 = vadd.f32 %v815_v51, %v302_v46  ;;  %v818_v63 = vmul.f32 %v2067_v2, %v561_v59  ;;  %1325 = vst [vmem:[%s2089_s24 + $0x150] sm:$0xff] %v1069_v55  ;;  %v1072_v4 = vadd.f32 %v816_v56, %v303_v52  ;;  %v563_v6 = vld [vmem:[%s2059_s28 + $0x188] sm:$0xff]  ;;  %v308_v7 = vld [vmem:[%s2051_s5 + $0x190] sm:$0xff] }
  0x95   : > { %v819_v5 = vmul.f32 %v2067_v2, %v562_v1  ;;  %v564_v8 = vld [vmem:[%s2059_s28 + $0x190] sm:$0xff]  ;;  %1326 = vst [vmem:[%s2089_s24 + $0x158] sm:$0xff] %v1070_v60  ;;  %v1073_v9 = vadd.f32 %v817_v62, %v304_v54  ;;  %v820_v11 = vmul.f32 %v2067_v2, %v563_v6  ;;  %v309_v13 = vld [vmem:[%s2051_s5 + $0x198] sm:$0xff]  ;;  %v310_v15 = vld [vmem:[%s2051_s5 + $0x1a0] sm:$0xff] }
  0x96   : > { %1327 = vst [vmem:[%s2089_s24 + $0x160] sm:$0xff] %v1071_v61  ;;  %v1074_v10 = vadd.f32 %v818_v63, %v305_v58  ;;  %v821_v12 = vmul.f32 %v2067_v2, %v564_v8  ;;  %v565_v14 = vld [vmem:[%s2059_s28 + $0x198] sm:$0xff]  ;;  %1328 = vst [vmem:[%s2089_s24 + $0x168] sm:$0xff] %v1072_v4  ;;  %v566_v18 = vld [vmem:[%s2059_s28 + $0x1a0] sm:$0xff] }
  0x97   : > { %v1075_v16 = vadd.f32 %v819_v5, %v306_v0  ;;  %v822_v17 = vmul.f32 %v2067_v2, %v565_v14  ;;  %v311_v19 = vld [vmem:[%s2051_s5 + $0x1a8] sm:$0xff]  ;;  %1329 = vst [vmem:[%s2089_s24 + $0x170] sm:$0xff] %v1073_v9  ;;  %v1076_v21 = vadd.f32 %v820_v11, %v307_v3  ;;  %v823_v23 = vmul.f32 %v2067_v2, %v566_v18  ;;  %v312_v25 = vld [vmem:[%s2051_s5 + $0x1b0] sm:$0xff]  ;;  %v313_v27 = vld [vmem:[%s2051_s5 + $0x1b8] sm:$0xff] }
  0x98   : > { %v567_v20 = vld [vmem:[%s2059_s28 + $0x1a8] sm:$0xff]  ;;  %1330 = vst [vmem:[%s2089_s24 + $0x178] sm:$0xff] %v1074_v10  ;;  %v1077_v22 = vadd.f32 %v821_v12, %v308_v7  ;;  %v568_v26 = vld [vmem:[%s2059_s28 + $0x1b0] sm:$0xff]  ;;  %v569_v30 = vld [vmem:[%s2059_s28 + $0x1b8] sm:$0xff] }
  0x99   : > { %v824_v24 = vmul.f32 %v2067_v2, %v567_v20  ;;  %1331 = vst [vmem:[%s2089_s24 + $0x180] sm:$0xff] %v1075_v16  ;;  %v1078_v28 = vadd.f32 %v822_v17, %v309_v13  ;;  %v825_v29 = vmul.f32 %v2067_v2, %v568_v26  ;;  %v314_v31 = vld [vmem:[%s2051_s5 + $0x1c0] sm:$0xff]  ;;  %1332 = vst [vmem:[%s2089_s24 + $0x188] sm:$0xff] %v1076_v21  ;;  %v315_v37 = vld [vmem:[%s2051_s5 + $0x1c8] sm:$0xff] }
  0x9a   : > { %v570_v32 = vld [vmem:[%s2059_s28 + $0x1c0] sm:$0xff]  ;;  %1333 = vst [vmem:[%s2089_s24 + $0x190] sm:$0xff] %v1077_v22  ;;  %v1079_v33 = vadd.f32 %v823_v23, %v310_v15  ;;  %v826_v35 = vmul.f32 %v2067_v2, %v569_v30  ;;  %v571_v38 = vld [vmem:[%s2059_s28 + $0x1c8] sm:$0xff]  ;;  %v316_v39 = vld [vmem:[%s2051_s5 + $0x1d0] sm:$0xff] }
  0x9b   : > { %v1080_v34 = vadd.f32 %v824_v24, %v311_v19  ;;  %v827_v36 = vmul.f32 %v2067_v2, %v570_v32  ;;  %1334 = vst [vmem:[%s2089_s24 + $0x198] sm:$0xff] %v1078_v28  ;;  %v1081_v40 = vadd.f32 %v825_v29, %v312_v25  ;;  %v828_v41 = vmul.f32 %v2067_v2, %v571_v38  ;;  %v572_v42 = vld [vmem:[%s2059_s28 + $0x1d0] sm:$0xff]  ;;  %v317_v43 = vld [vmem:[%s2051_s5 + $0x1d8] sm:$0xff]  ;;  %v318_v49 = vld [vmem:[%s2051_s5 + $0x1e0] sm:$0xff] }
  0x9c   : > { %v573_v44 = vld [vmem:[%s2059_s28 + $0x1d8] sm:$0xff]  ;;  %1335 = vst [vmem:[%s2089_s24 + $0x1a0] sm:$0xff] %v1079_v33  ;;  %v1082_v45 = vadd.f32 %v826_v35, %v313_v27  ;;  %v829_v47 = vmul.f32 %v2067_v2, %v572_v42  ;;  %v574_v50 = vld [vmem:[%s2059_s28 + $0x1e0] sm:$0xff]  ;;  %v319_v51 = vld [vmem:[%s2051_s5 + $0x1e8] sm:$0xff] }
  0x9d   : > { %1336 = vst [vmem:[%s2089_s24 + $0x1a8] sm:$0xff] %v1080_v34  ;;  %v1083_v46 = vadd.f32 %v827_v36, %v314_v31  ;;  %v830_v48 = vmul.f32 %v2067_v2, %v573_v44  ;;  %1337 = vst [vmem:[%s2089_s24 + $0x1b0] sm:$0xff] %v1081_v40  ;;  %v1084_v52 = vadd.f32 %v828_v41, %v315_v37  ;;  %v575_v54 = vld [vmem:[%s2059_s28 + $0x1e8] sm:$0xff]  ;;  %v320_v55 = vld [vmem:[%s2051_s5 + $0x1f0] sm:$0xff] }
  0x9e   : > { %v831_v53 = vmul.f32 %v2067_v2, %v574_v50  ;;  %v576_v56 = vld [vmem:[%s2059_s28 + $0x1f0] sm:$0xff]  ;;  %1338 = vst [vmem:[%s2089_s24 + $0x1b8] sm:$0xff] %v1082_v45  ;;  %v1085_v57 = vadd.f32 %v829_v47, %v316_v39  ;;  %v832_v59 = vmul.f32 %v2067_v2, %v575_v54  ;;  %v321_v61 = vld [vmem:[%s2051_s5 + $0x1f8] sm:$0xff]  ;;  %v322_v63 = vld [vmem:[%s2051_s5 + $0x200] sm:$0xff] }
  0x9f   : > { %1339 = vst [vmem:[%s2089_s24 + $0x1c0] sm:$0xff] %v1083_v46  ;;  %v1086_v58 = vadd.f32 %v830_v48, %v317_v43  ;;  %v833_v60 = vmul.f32 %v2067_v2, %v576_v56  ;;  %v577_v62 = vld [vmem:[%s2059_s28 + $0x1f8] sm:$0xff]  ;;  %1340 = vst [vmem:[%s2089_s24 + $0x1c8] sm:$0xff] %v1084_v52  ;;  %v578_v3 = vld [vmem:[%s2059_s28 + $0x200] sm:$0xff] }
  0xa0   : > { %v1087_v0 = vadd.f32 %v831_v53, %v318_v49  ;;  %v834_v1 = vmul.f32 %v2067_v2, %v577_v62  ;;  %v323_v4 = vld [vmem:[%s2051_s5 + $0x208] sm:$0xff]  ;;  %1341 = vst [vmem:[%s2089_s24 + $0x1d0] sm:$0xff] %v1085_v57  ;;  %v1088_v6 = vadd.f32 %v832_v59, %v319_v51  ;;  %v835_v8 = vmul.f32 %v2067_v2, %v578_v3  ;;  %v324_v10 = vld [vmem:[%s2051_s5 + $0x210] sm:$0xff]  ;;  %v325_v12 = vld [vmem:[%s2051_s5 + $0x218] sm:$0xff] }
  0xa1   : > { %v579_v5 = vld [vmem:[%s2059_s28 + $0x208] sm:$0xff]  ;;  %1342 = vst [vmem:[%s2089_s24 + $0x1d8] sm:$0xff] %v1086_v58  ;;  %v1089_v7 = vadd.f32 %v833_v60, %v320_v55  ;;  %v580_v11 = vld [vmem:[%s2059_s28 + $0x210] sm:$0xff]  ;;  %v581_v15 = vld [vmem:[%s2059_s28 + $0x218] sm:$0xff] }
  0xa2   : > { %v836_v9 = vmul.f32 %v2067_v2, %v579_v5  ;;  %1343 = vst [vmem:[%s2089_s24 + $0x1e0] sm:$0xff] %v1087_v0  ;;  %v1090_v13 = vadd.f32 %v834_v1, %v321_v61  ;;  %v837_v14 = vmul.f32 %v2067_v2, %v580_v11  ;;  %v326_v16 = vld [vmem:[%s2051_s5 + $0x220] sm:$0xff]  ;;  %1344 = vst [vmem:[%s2089_s24 + $0x1e8] sm:$0xff] %v1088_v6  ;;  %v327_v22 = vld [vmem:[%s2051_s5 + $0x228] sm:$0xff] }
  0xa3   : > { %v582_v17 = vld [vmem:[%s2059_s28 + $0x220] sm:$0xff]  ;;  %1345 = vst [vmem:[%s2089_s24 + $0x1f0] sm:$0xff] %v1089_v7  ;;  %v1091_v18 = vadd.f32 %v835_v8, %v322_v63  ;;  %v838_v20 = vmul.f32 %v2067_v2, %v581_v15  ;;  %v583_v23 = vld [vmem:[%s2059_s28 + $0x228] sm:$0xff]  ;;  %v328_v24 = vld [vmem:[%s2051_s5 + $0x230] sm:$0xff] }
  0xa4   : > { %v1092_v19 = vadd.f32 %v836_v9, %v323_v4  ;;  %v839_v21 = vmul.f32 %v2067_v2, %v582_v17  ;;  %1346 = vst [vmem:[%s2089_s24 + $0x1f8] sm:$0xff] %v1090_v13  ;;  %v1093_v25 = vadd.f32 %v837_v14, %v324_v10  ;;  %v840_v26 = vmul.f32 %v2067_v2, %v583_v23  ;;  %v584_v27 = vld [vmem:[%s2059_s28 + $0x230] sm:$0xff]  ;;  %v329_v28 = vld [vmem:[%s2051_s5 + $0x238] sm:$0xff]  ;;  %v330_v34 = vld [vmem:[%s2051_s5 + $0x240] sm:$0xff] }
  0xa5   : > { %v585_v29 = vld [vmem:[%s2059_s28 + $0x238] sm:$0xff]  ;;  %1347 = vst [vmem:[%s2089_s24 + $0x200] sm:$0xff] %v1091_v18  ;;  %v1094_v30 = vadd.f32 %v838_v20, %v325_v12  ;;  %v841_v32 = vmul.f32 %v2067_v2, %v584_v27  ;;  %v586_v35 = vld [vmem:[%s2059_s28 + $0x240] sm:$0xff]  ;;  %v331_v36 = vld [vmem:[%s2051_s5 + $0x248] sm:$0xff] }
  0xa6   : > { %1348 = vst [vmem:[%s2089_s24 + $0x208] sm:$0xff] %v1092_v19  ;;  %v1095_v31 = vadd.f32 %v839_v21, %v326_v16  ;;  %v842_v33 = vmul.f32 %v2067_v2, %v585_v29  ;;  %1349 = vst [vmem:[%s2089_s24 + $0x210] sm:$0xff] %v1093_v25  ;;  %v1096_v37 = vadd.f32 %v840_v26, %v327_v22  ;;  %v587_v39 = vld [vmem:[%s2059_s28 + $0x248] sm:$0xff]  ;;  %v332_v40 = vld [vmem:[%s2051_s5 + $0x250] sm:$0xff] }
  0xa7   : > { %v843_v38 = vmul.f32 %v2067_v2, %v586_v35  ;;  %v588_v41 = vld [vmem:[%s2059_s28 + $0x250] sm:$0xff]  ;;  %1350 = vst [vmem:[%s2089_s24 + $0x218] sm:$0xff] %v1094_v30  ;;  %v1097_v42 = vadd.f32 %v841_v32, %v328_v24  ;;  %v844_v44 = vmul.f32 %v2067_v2, %v587_v39  ;;  %v333_v46 = vld [vmem:[%s2051_s5 + $0x258] sm:$0xff]  ;;  %v334_v48 = vld [vmem:[%s2051_s5 + $0x260] sm:$0xff] }
  0xa8   : > { %1351 = vst [vmem:[%s2089_s24 + $0x220] sm:$0xff] %v1095_v31  ;;  %v1098_v43 = vadd.f32 %v842_v33, %v329_v28  ;;  %v845_v45 = vmul.f32 %v2067_v2, %v588_v41  ;;  %v589_v47 = vld [vmem:[%s2059_s28 + $0x258] sm:$0xff]  ;;  %1352 = vst [vmem:[%s2089_s24 + $0x228] sm:$0xff] %v1096_v37  ;;  %v590_v51 = vld [vmem:[%s2059_s28 + $0x260] sm:$0xff] }
  0xa9   : > { %v1099_v49 = vadd.f32 %v843_v38, %v330_v34  ;;  %v846_v50 = vmul.f32 %v2067_v2, %v589_v47  ;;  %v335_v52 = vld [vmem:[%s2051_s5 + $0x268] sm:$0xff]  ;;  %1353 = vst [vmem:[%s2089_s24 + $0x230] sm:$0xff] %v1097_v42  ;;  %v1100_v54 = vadd.f32 %v844_v44, %v331_v36  ;;  %v847_v56 = vmul.f32 %v2067_v2, %v590_v51  ;;  %v336_v58 = vld [vmem:[%s2051_s5 + $0x270] sm:$0xff]  ;;  %v337_v60 = vld [vmem:[%s2051_s5 + $0x278] sm:$0xff] }
  0xaa   : > { %v591_v53 = vld [vmem:[%s2059_s28 + $0x268] sm:$0xff]  ;;  %1354 = vst [vmem:[%s2089_s24 + $0x238] sm:$0xff] %v1098_v43  ;;  %v1101_v55 = vadd.f32 %v845_v45, %v332_v40  ;;  %v592_v59 = vld [vmem:[%s2059_s28 + $0x270] sm:$0xff]  ;;  %v593_v63 = vld [vmem:[%s2059_s28 + $0x278] sm:$0xff] }
  0xab   : > { %v848_v57 = vmul.f32 %v2067_v2, %v591_v53  ;;  %1355 = vst [vmem:[%s2089_s24 + $0x240] sm:$0xff] %v1099_v49  ;;  %v1102_v61 = vadd.f32 %v846_v50, %v333_v46  ;;  %v849_v62 = vmul.f32 %v2067_v2, %v592_v59  ;;  %v338_v0 = vld [vmem:[%s2051_s5 + $0x280] sm:$0xff]  ;;  %1356 = vst [vmem:[%s2089_s24 + $0x248] sm:$0xff] %v1100_v54  ;;  %v339_v7 = vld [vmem:[%s2051_s5 + $0x288] sm:$0xff] }
  0xac   : > { %v594_v1 = vld [vmem:[%s2059_s28 + $0x280] sm:$0xff]  ;;  %1357 = vst [vmem:[%s2089_s24 + $0x250] sm:$0xff] %v1101_v55  ;;  %v1103_v3 = vadd.f32 %v847_v56, %v334_v48  ;;  %v850_v5 = vmul.f32 %v2067_v2, %v593_v63  ;;  %v595_v8 = vld [vmem:[%s2059_s28 + $0x288] sm:$0xff]  ;;  %v340_v9 = vld [vmem:[%s2051_s5 + $0x290] sm:$0xff] }
  0xad   : > { %v1104_v4 = vadd.f32 %v848_v57, %v335_v52  ;;  %v851_v6 = vmul.f32 %v2067_v2, %v594_v1  ;;  %1358 = vst [vmem:[%s2089_s24 + $0x258] sm:$0xff] %v1102_v61  ;;  %v1105_v10 = vadd.f32 %v849_v62, %v336_v58  ;;  %v852_v11 = vmul.f32 %v2067_v2, %v595_v8  ;;  %v596_v12 = vld [vmem:[%s2059_s28 + $0x290] sm:$0xff]  ;;  %v341_v13 = vld [vmem:[%s2051_s5 + $0x298] sm:$0xff]  ;;  %v342_v19 = vld [vmem:[%s2051_s5 + $0x2a0] sm:$0xff] }
  0xae   : > { %v597_v14 = vld [vmem:[%s2059_s28 + $0x298] sm:$0xff]  ;;  %1359 = vst [vmem:[%s2089_s24 + $0x260] sm:$0xff] %v1103_v3  ;;  %v1106_v15 = vadd.f32 %v850_v5, %v337_v60  ;;  %v853_v17 = vmul.f32 %v2067_v2, %v596_v12  ;;  %v598_v20 = vld [vmem:[%s2059_s28 + $0x2a0] sm:$0xff]  ;;  %v343_v21 = vld [vmem:[%s2051_s5 + $0x2a8] sm:$0xff] }
  0xaf   : > { %1360 = vst [vmem:[%s2089_s24 + $0x268] sm:$0xff] %v1104_v4  ;;  %v1107_v16 = vadd.f32 %v851_v6, %v338_v0  ;;  %v854_v18 = vmul.f32 %v2067_v2, %v597_v14  ;;  %1361 = vst [vmem:[%s2089_s24 + $0x270] sm:$0xff] %v1105_v10  ;;  %v1108_v22 = vadd.f32 %v852_v11, %v339_v7  ;;  %v599_v24 = vld [vmem:[%s2059_s28 + $0x2a8] sm:$0xff]  ;;  %v344_v25 = vld [vmem:[%s2051_s5 + $0x2b0] sm:$0xff] }
  0xb0   : > { %v855_v23 = vmul.f32 %v2067_v2, %v598_v20  ;;  %v600_v26 = vld [vmem:[%s2059_s28 + $0x2b0] sm:$0xff]  ;;  %1362 = vst [vmem:[%s2089_s24 + $0x278] sm:$0xff] %v1106_v15  ;;  %v1109_v27 = vadd.f32 %v853_v17, %v340_v9  ;;  %v856_v29 = vmul.f32 %v2067_v2, %v599_v24  ;;  %v345_v31 = vld [vmem:[%s2051_s5 + $0x2b8] sm:$0xff]  ;;  %v346_v33 = vld [vmem:[%s2051_s5 + $0x2c0] sm:$0xff] }
  0xb1   : > { %1363 = vst [vmem:[%s2089_s24 + $0x280] sm:$0xff] %v1107_v16  ;;  %v1110_v28 = vadd.f32 %v854_v18, %v341_v13  ;;  %v857_v30 = vmul.f32 %v2067_v2, %v600_v26  ;;  %v601_v32 = vld [vmem:[%s2059_s28 + $0x2b8] sm:$0xff]  ;;  %1364 = vst [vmem:[%s2089_s24 + $0x288] sm:$0xff] %v1108_v22  ;;  %v602_v36 = vld [vmem:[%s2059_s28 + $0x2c0] sm:$0xff] }
  0xb2   : > { %v1111_v34 = vadd.f32 %v855_v23, %v342_v19  ;;  %v858_v35 = vmul.f32 %v2067_v2, %v601_v32  ;;  %v347_v37 = vld [vmem:[%s2051_s5 + $0x2c8] sm:$0xff]  ;;  %1365 = vst [vmem:[%s2089_s24 + $0x290] sm:$0xff] %v1109_v27  ;;  %v1112_v39 = vadd.f32 %v856_v29, %v343_v21  ;;  %v859_v41 = vmul.f32 %v2067_v2, %v602_v36  ;;  %v348_v43 = vld [vmem:[%s2051_s5 + $0x2d0] sm:$0xff]  ;;  %v349_v45 = vld [vmem:[%s2051_s5 + $0x2d8] sm:$0xff] }
  0xb3   : > { %v603_v38 = vld [vmem:[%s2059_s28 + $0x2c8] sm:$0xff]  ;;  %1366 = vst [vmem:[%s2089_s24 + $0x298] sm:$0xff] %v1110_v28  ;;  %v1113_v40 = vadd.f32 %v857_v30, %v344_v25  ;;  %v604_v44 = vld [vmem:[%s2059_s28 + $0x2d0] sm:$0xff]  ;;  %v605_v48 = vld [vmem:[%s2059_s28 + $0x2d8] sm:$0xff] }
  0xb4   : > { %v860_v42 = vmul.f32 %v2067_v2, %v603_v38  ;;  %1367 = vst [vmem:[%s2089_s24 + $0x2a0] sm:$0xff] %v1111_v34  ;;  %v1114_v46 = vadd.f32 %v858_v35, %v345_v31  ;;  %v861_v47 = vmul.f32 %v2067_v2, %v604_v44  ;;  %v350_v49 = vld [vmem:[%s2051_s5 + $0x2e0] sm:$0xff]  ;;  %1368 = vst [vmem:[%s2089_s24 + $0x2a8] sm:$0xff] %v1112_v39  ;;  %v351_v55 = vld [vmem:[%s2051_s5 + $0x2e8] sm:$0xff] }
  0xb5   : > { %v606_v50 = vld [vmem:[%s2059_s28 + $0x2e0] sm:$0xff]  ;;  %1369 = vst [vmem:[%s2089_s24 + $0x2b0] sm:$0xff] %v1113_v40  ;;  %v1115_v51 = vadd.f32 %v859_v41, %v346_v33  ;;  %v862_v53 = vmul.f32 %v2067_v2, %v605_v48  ;;  %v607_v56 = vld [vmem:[%s2059_s28 + $0x2e8] sm:$0xff]  ;;  %v352_v57 = vld [vmem:[%s2051_s5 + $0x2f0] sm:$0xff] }
  0xb6   : > { %v1116_v52 = vadd.f32 %v860_v42, %v347_v37  ;;  %v863_v54 = vmul.f32 %v2067_v2, %v606_v50  ;;  %1370 = vst [vmem:[%s2089_s24 + $0x2b8] sm:$0xff] %v1114_v46  ;;  %v1117_v58 = vadd.f32 %v861_v47, %v348_v43  ;;  %v864_v59 = vmul.f32 %v2067_v2, %v607_v56  ;;  %v608_v60 = vld [vmem:[%s2059_s28 + $0x2f0] sm:$0xff]  ;;  %v353_v61 = vld [vmem:[%s2051_s5 + $0x2f8] sm:$0xff]  ;;  %v354_v4 = vld [vmem:[%s2051_s5 + $0x300] sm:$0xff] }
  0xb7   : > { %v609_v62 = vld [vmem:[%s2059_s28 + $0x2f8] sm:$0xff]  ;;  %1371 = vst [vmem:[%s2089_s24 + $0x2c0] sm:$0xff] %v1115_v51  ;;  %v1118_v63 = vadd.f32 %v862_v53, %v349_v45  ;;  %v865_v1 = vmul.f32 %v2067_v2, %v608_v60  ;;  %v610_v5 = vld [vmem:[%s2059_s28 + $0x300] sm:$0xff]  ;;  %v355_v6 = vld [vmem:[%s2051_s5 + $0x308] sm:$0xff] }
  0xb8   : > { %1372 = vst [vmem:[%s2089_s24 + $0x2c8] sm:$0xff] %v1116_v52  ;;  %v1119_v0 = vadd.f32 %v863_v54, %v350_v49  ;;  %v866_v3 = vmul.f32 %v2067_v2, %v609_v62  ;;  %1373 = vst [vmem:[%s2089_s24 + $0x2d0] sm:$0xff] %v1117_v58  ;;  %v1120_v7 = vadd.f32 %v864_v59, %v351_v55  ;;  %v611_v9 = vld [vmem:[%s2059_s28 + $0x308] sm:$0xff]  ;;  %v356_v10 = vld [vmem:[%s2051_s5 + $0x310] sm:$0xff] }
  0xb9   : > { %v867_v8 = vmul.f32 %v2067_v2, %v610_v5  ;;  %v612_v11 = vld [vmem:[%s2059_s28 + $0x310] sm:$0xff]  ;;  %1374 = vst [vmem:[%s2089_s24 + $0x2d8] sm:$0xff] %v1118_v63  ;;  %v1121_v12 = vadd.f32 %v865_v1, %v352_v57  ;;  %v868_v14 = vmul.f32 %v2067_v2, %v611_v9  ;;  %v357_v16 = vld [vmem:[%s2051_s5 + $0x318] sm:$0xff]  ;;  %v358_v18 = vld [vmem:[%s2051_s5 + $0x320] sm:$0xff] }
  0xba   : > { %1375 = vst [vmem:[%s2089_s24 + $0x2e0] sm:$0xff] %v1119_v0  ;;  %v1122_v13 = vadd.f32 %v866_v3, %v353_v61  ;;  %v869_v15 = vmul.f32 %v2067_v2, %v612_v11  ;;  %v613_v17 = vld [vmem:[%s2059_s28 + $0x318] sm:$0xff]  ;;  %1376 = vst [vmem:[%s2089_s24 + $0x2e8] sm:$0xff] %v1120_v7  ;;  %v614_v21 = vld [vmem:[%s2059_s28 + $0x320] sm:$0xff] }
  0xbb   : > { %v1123_v19 = vadd.f32 %v867_v8, %v354_v4  ;;  %v870_v20 = vmul.f32 %v2067_v2, %v613_v17  ;;  %v359_v22 = vld [vmem:[%s2051_s5 + $0x328] sm:$0xff]  ;;  %1377 = vst [vmem:[%s2089_s24 + $0x2f0] sm:$0xff] %v1121_v12  ;;  %v1124_v24 = vadd.f32 %v868_v14, %v355_v6  ;;  %v871_v26 = vmul.f32 %v2067_v2, %v614_v21  ;;  %v360_v28 = vld [vmem:[%s2051_s5 + $0x330] sm:$0xff]  ;;  %v361_v30 = vld [vmem:[%s2051_s5 + $0x338] sm:$0xff] }
  0xbc   : > { %v615_v23 = vld [vmem:[%s2059_s28 + $0x328] sm:$0xff]  ;;  %1378 = vst [vmem:[%s2089_s24 + $0x2f8] sm:$0xff] %v1122_v13  ;;  %v1125_v25 = vadd.f32 %v869_v15, %v356_v10  ;;  %v616_v29 = vld [vmem:[%s2059_s28 + $0x330] sm:$0xff]  ;;  %v617_v33 = vld [vmem:[%s2059_s28 + $0x338] sm:$0xff] }
  0xbd   : > { %v872_v27 = vmul.f32 %v2067_v2, %v615_v23  ;;  %1379 = vst [vmem:[%s2089_s24 + $0x300] sm:$0xff] %v1123_v19  ;;  %v1126_v31 = vadd.f32 %v870_v20, %v357_v16  ;;  %v873_v32 = vmul.f32 %v2067_v2, %v616_v29  ;;  %v362_v34 = vld [vmem:[%s2051_s5 + $0x340] sm:$0xff]  ;;  %1380 = vst [vmem:[%s2089_s24 + $0x308] sm:$0xff] %v1124_v24  ;;  %v363_v40 = vld [vmem:[%s2051_s5 + $0x348] sm:$0xff] }
  0xbe   : > { %v618_v35 = vld [vmem:[%s2059_s28 + $0x340] sm:$0xff]  ;;  %1381 = vst [vmem:[%s2089_s24 + $0x310] sm:$0xff] %v1125_v25  ;;  %v1127_v36 = vadd.f32 %v871_v26, %v358_v18  ;;  %v874_v38 = vmul.f32 %v2067_v2, %v617_v33  ;;  %v619_v41 = vld [vmem:[%s2059_s28 + $0x348] sm:$0xff]  ;;  %v364_v42 = vld [vmem:[%s2051_s5 + $0x350] sm:$0xff] }
  0xbf   : > { %v1128_v37 = vadd.f32 %v872_v27, %v359_v22  ;;  %v875_v39 = vmul.f32 %v2067_v2, %v618_v35  ;;  %1382 = vst [vmem:[%s2089_s24 + $0x318] sm:$0xff] %v1126_v31  ;;  %v1129_v43 = vadd.f32 %v873_v32, %v360_v28  ;;  %v876_v44 = vmul.f32 %v2067_v2, %v619_v41  ;;  %v620_v45 = vld [vmem:[%s2059_s28 + $0x350] sm:$0xff]  ;;  %v365_v46 = vld [vmem:[%s2051_s5 + $0x358] sm:$0xff]  ;;  %v366_v52 = vld [vmem:[%s2051_s5 + $0x360] sm:$0xff] }
  0xc0   : > { %v621_v47 = vld [vmem:[%s2059_s28 + $0x358] sm:$0xff]  ;;  %1383 = vst [vmem:[%s2089_s24 + $0x320] sm:$0xff] %v1127_v36  ;;  %v1130_v48 = vadd.f32 %v874_v38, %v361_v30  ;;  %v877_v50 = vmul.f32 %v2067_v2, %v620_v45  ;;  %v622_v53 = vld [vmem:[%s2059_s28 + $0x360] sm:$0xff]  ;;  %v367_v54 = vld [vmem:[%s2051_s5 + $0x368] sm:$0xff] }
  0xc1   : > { %1384 = vst [vmem:[%s2089_s24 + $0x328] sm:$0xff] %v1128_v37  ;;  %v1131_v49 = vadd.f32 %v875_v39, %v362_v34  ;;  %v878_v51 = vmul.f32 %v2067_v2, %v621_v47  ;;  %1385 = vst [vmem:[%s2089_s24 + $0x330] sm:$0xff] %v1129_v43  ;;  %v1132_v55 = vadd.f32 %v876_v44, %v363_v40  ;;  %v623_v57 = vld [vmem:[%s2059_s28 + $0x368] sm:$0xff]  ;;  %v368_v58 = vld [vmem:[%s2051_s5 + $0x370] sm:$0xff] }
  0xc2   : > { %v879_v56 = vmul.f32 %v2067_v2, %v622_v53  ;;  %v624_v59 = vld [vmem:[%s2059_s28 + $0x370] sm:$0xff]  ;;  %1386 = vst [vmem:[%s2089_s24 + $0x338] sm:$0xff] %v1130_v48  ;;  %v1133_v60 = vadd.f32 %v877_v50, %v364_v42  ;;  %v880_v62 = vmul.f32 %v2067_v2, %v623_v57  ;;  %v369_v0 = vld [vmem:[%s2051_s5 + $0x378] sm:$0xff]  ;;  %v370_v3 = vld [vmem:[%s2051_s5 + $0x380] sm:$0xff] }
  0xc3   : > { %1387 = vst [vmem:[%s2089_s24 + $0x340] sm:$0xff] %v1131_v49  ;;  %v1134_v61 = vadd.f32 %v878_v51, %v365_v46  ;;  %v881_v63 = vmul.f32 %v2067_v2, %v624_v59  ;;  %v625_v1 = vld [vmem:[%s2059_s28 + $0x378] sm:$0xff]  ;;  %1388 = vst [vmem:[%s2089_s24 + $0x348] sm:$0xff] %v1132_v55  ;;  %v626_v6 = vld [vmem:[%s2059_s28 + $0x380] sm:$0xff] }
  0xc4   : > { %v1135_v4 = vadd.f32 %v879_v56, %v366_v52  ;;  %v882_v5 = vmul.f32 %v2067_v2, %v625_v1  ;;  %v371_v7 = vld [vmem:[%s2051_s5 + $0x388] sm:$0xff]  ;;  %1389 = vst [vmem:[%s2089_s24 + $0x350] sm:$0xff] %v1133_v60  ;;  %v1136_v9 = vadd.f32 %v880_v62, %v367_v54  ;;  %v883_v11 = vmul.f32 %v2067_v2, %v626_v6  ;;  %v372_v13 = vld [vmem:[%s2051_s5 + $0x390] sm:$0xff]  ;;  %v373_v15 = vld [vmem:[%s2051_s5 + $0x398] sm:$0xff] }
  0xc5   : > { %v627_v8 = vld [vmem:[%s2059_s28 + $0x388] sm:$0xff]  ;;  %1390 = vst [vmem:[%s2089_s24 + $0x358] sm:$0xff] %v1134_v61  ;;  %v1137_v10 = vadd.f32 %v881_v63, %v368_v58  ;;  %v628_v14 = vld [vmem:[%s2059_s28 + $0x390] sm:$0xff]  ;;  %v629_v18 = vld [vmem:[%s2059_s28 + $0x398] sm:$0xff] }
  0xc6   : > { %v884_v12 = vmul.f32 %v2067_v2, %v627_v8  ;;  %1391 = vst [vmem:[%s2089_s24 + $0x360] sm:$0xff] %v1135_v4  ;;  %v1138_v16 = vadd.f32 %v882_v5, %v369_v0  ;;  %v885_v17 = vmul.f32 %v2067_v2, %v628_v14  ;;  %v374_v19 = vld [vmem:[%s2051_s5 + $0x3a0] sm:$0xff]  ;;  %1392 = vst [vmem:[%s2089_s24 + $0x368] sm:$0xff] %v1136_v9  ;;  %v375_v25 = vld [vmem:[%s2051_s5 + $0x3a8] sm:$0xff] }
  0xc7   : > { %v630_v20 = vld [vmem:[%s2059_s28 + $0x3a0] sm:$0xff]  ;;  %1393 = vst [vmem:[%s2089_s24 + $0x370] sm:$0xff] %v1137_v10  ;;  %v1139_v21 = vadd.f32 %v883_v11, %v370_v3  ;;  %v886_v23 = vmul.f32 %v2067_v2, %v629_v18  ;;  %v631_v26 = vld [vmem:[%s2059_s28 + $0x3a8] sm:$0xff]  ;;  %v376_v27 = vld [vmem:[%s2051_s5 + $0x3b0] sm:$0xff] }
  0xc8   : > { %v1140_v22 = vadd.f32 %v884_v12, %v371_v7  ;;  %v887_v24 = vmul.f32 %v2067_v2, %v630_v20  ;;  %1394 = vst [vmem:[%s2089_s24 + $0x378] sm:$0xff] %v1138_v16  ;;  %v1141_v28 = vadd.f32 %v885_v17, %v372_v13  ;;  %v888_v29 = vmul.f32 %v2067_v2, %v631_v26  ;;  %v632_v30 = vld [vmem:[%s2059_s28 + $0x3b0] sm:$0xff]  ;;  %v377_v31 = vld [vmem:[%s2051_s5 + $0x3b8] sm:$0xff]  ;;  %v378_v37 = vld [vmem:[%s2051_s5 + $0x3c0] sm:$0xff] }
  0xc9   : > { %v633_v32 = vld [vmem:[%s2059_s28 + $0x3b8] sm:$0xff]  ;;  %1395 = vst [vmem:[%s2089_s24 + $0x380] sm:$0xff] %v1139_v21  ;;  %v1142_v33 = vadd.f32 %v886_v23, %v373_v15  ;;  %v889_v35 = vmul.f32 %v2067_v2, %v632_v30  ;;  %v634_v38 = vld [vmem:[%s2059_s28 + $0x3c0] sm:$0xff]  ;;  %v379_v39 = vld [vmem:[%s2051_s5 + $0x3c8] sm:$0xff] }
  0xca   : > { %1396 = vst [vmem:[%s2089_s24 + $0x388] sm:$0xff] %v1140_v22  ;;  %v1143_v34 = vadd.f32 %v887_v24, %v374_v19  ;;  %v890_v36 = vmul.f32 %v2067_v2, %v633_v32  ;;  %1397 = vst [vmem:[%s2089_s24 + $0x390] sm:$0xff] %v1141_v28  ;;  %v1144_v40 = vadd.f32 %v888_v29, %v375_v25  ;;  %v635_v42 = vld [vmem:[%s2059_s28 + $0x3c8] sm:$0xff]  ;;  %v380_v43 = vld [vmem:[%s2051_s5 + $0x3d0] sm:$0xff] }
  0xcb   : > { %v891_v41 = vmul.f32 %v2067_v2, %v634_v38  ;;  %v636_v44 = vld [vmem:[%s2059_s28 + $0x3d0] sm:$0xff]  ;;  %1398 = vst [vmem:[%s2089_s24 + $0x398] sm:$0xff] %v1142_v33  ;;  %v1145_v45 = vadd.f32 %v889_v35, %v376_v27  ;;  %v892_v47 = vmul.f32 %v2067_v2, %v635_v42  ;;  %v381_v49 = vld [vmem:[%s2051_s5 + $0x3d8] sm:$0xff]  ;;  %v382_v51 = vld [vmem:[%s2051_s5 + $0x3e0] sm:$0xff] }
  0xcc   : > { %1399 = vst [vmem:[%s2089_s24 + $0x3a0] sm:$0xff] %v1143_v34  ;;  %v1146_v46 = vadd.f32 %v890_v36, %v377_v31  ;;  %v893_v48 = vmul.f32 %v2067_v2, %v636_v44  ;;  %v637_v50 = vld [vmem:[%s2059_s28 + $0x3d8] sm:$0xff]  ;;  %1400 = vst [vmem:[%s2089_s24 + $0x3a8] sm:$0xff] %v1144_v40  ;;  %v638_v54 = vld [vmem:[%s2059_s28 + $0x3e0] sm:$0xff] }
  0xcd   : > { %v1147_v52 = vadd.f32 %v891_v41, %v378_v37  ;;  %v894_v53 = vmul.f32 %v2067_v2, %v637_v50  ;;  %v383_v55 = vld [vmem:[%s2051_s5 + $0x3e8] sm:$0xff]  ;;  %1401 = vst [vmem:[%s2089_s24 + $0x3b0] sm:$0xff] %v1145_v45  ;;  %v1148_v57 = vadd.f32 %v892_v47, %v379_v39  ;;  %v895_v59 = vmul.f32 %v2067_v2, %v638_v54  ;;  %v384_v61 = vld [vmem:[%s2051_s5 + $0x3f0] sm:$0xff]  ;;  %v385_v63 = vld [vmem:[%s2051_s5 + $0x3f8] sm:$0xff] }
  0xce   : > { %v639_v56 = vld [vmem:[%s2059_s28 + $0x3e8] sm:$0xff]  ;;  %1402 = vst [vmem:[%s2089_s24 + $0x3b8] sm:$0xff] %v1146_v46  ;;  %v1149_v58 = vadd.f32 %v893_v48, %v380_v43  ;;  %v640_v62 = vld [vmem:[%s2059_s28 + $0x3f0] sm:$0xff]  ;;  %v641_v3 = vld [vmem:[%s2059_s28 + $0x3f8] sm:$0xff] }
  0xcf   : > { %v896_v60 = vmul.f32 %v2067_v2, %v639_v56  ;;  %1403 = vst [vmem:[%s2089_s24 + $0x3c0] sm:$0xff] %v1147_v52  ;;  %v1150_v0 = vadd.f32 %v894_v53, %v381_v49  ;;  %v897_v1 = vmul.f32 %v2067_v2, %v640_v62  ;;  %v386_v4 = vld [vmem:[%s2051_s5 + $0x400] sm:$0xff]  ;;  %1404 = vst [vmem:[%s2089_s24 + $0x3c8] sm:$0xff] %v1148_v57  ;;  %v387_v10 = vld [vmem:[%s2051_s5 + $0x408] sm:$0xff] }
  0xd0   : > { %v642_v5 = vld [vmem:[%s2059_s28 + $0x400] sm:$0xff]  ;;  %1405 = vst [vmem:[%s2089_s24 + $0x3d0] sm:$0xff] %v1149_v58  ;;  %v1151_v6 = vadd.f32 %v895_v59, %v382_v51  ;;  %v898_v8 = vmul.f32 %v2067_v2, %v641_v3  ;;  %v643_v11 = vld [vmem:[%s2059_s28 + $0x408] sm:$0xff]  ;;  %v388_v12 = vld [vmem:[%s2051_s5 + $0x410] sm:$0xff] }
  0xd1   : > { %v1152_v7 = vadd.f32 %v896_v60, %v383_v55  ;;  %v899_v9 = vmul.f32 %v2067_v2, %v642_v5  ;;  %1406 = vst [vmem:[%s2089_s24 + $0x3d8] sm:$0xff] %v1150_v0  ;;  %v1153_v13 = vadd.f32 %v897_v1, %v384_v61  ;;  %v900_v14 = vmul.f32 %v2067_v2, %v643_v11  ;;  %v644_v15 = vld [vmem:[%s2059_s28 + $0x410] sm:$0xff]  ;;  %v389_v16 = vld [vmem:[%s2051_s5 + $0x418] sm:$0xff]  ;;  %v390_v22 = vld [vmem:[%s2051_s5 + $0x420] sm:$0xff] }
  0xd2   : > { %v645_v17 = vld [vmem:[%s2059_s28 + $0x418] sm:$0xff]  ;;  %1407 = vst [vmem:[%s2089_s24 + $0x3e0] sm:$0xff] %v1151_v6  ;;  %v1154_v18 = vadd.f32 %v898_v8, %v385_v63  ;;  %v901_v20 = vmul.f32 %v2067_v2, %v644_v15  ;;  %v646_v23 = vld [vmem:[%s2059_s28 + $0x420] sm:$0xff]  ;;  %v391_v24 = vld [vmem:[%s2051_s5 + $0x428] sm:$0xff] }
  0xd3   : > { %1408 = vst [vmem:[%s2089_s24 + $0x3e8] sm:$0xff] %v1152_v7  ;;  %v1155_v19 = vadd.f32 %v899_v9, %v386_v4  ;;  %v902_v21 = vmul.f32 %v2067_v2, %v645_v17  ;;  %1409 = vst [vmem:[%s2089_s24 + $0x3f0] sm:$0xff] %v1153_v13  ;;  %v1156_v25 = vadd.f32 %v900_v14, %v387_v10  ;;  %v647_v27 = vld [vmem:[%s2059_s28 + $0x428] sm:$0xff]  ;;  %v392_v28 = vld [vmem:[%s2051_s5 + $0x430] sm:$0xff] }
  0xd4   : > { %v903_v26 = vmul.f32 %v2067_v2, %v646_v23  ;;  %v648_v29 = vld [vmem:[%s2059_s28 + $0x430] sm:$0xff]  ;;  %1410 = vst [vmem:[%s2089_s24 + $0x3f8] sm:$0xff] %v1154_v18  ;;  %v1157_v30 = vadd.f32 %v901_v20, %v388_v12  ;;  %v904_v32 = vmul.f32 %v2067_v2, %v647_v27  ;;  %v393_v34 = vld [vmem:[%s2051_s5 + $0x438] sm:$0xff]  ;;  %v394_v36 = vld [vmem:[%s2051_s5 + $0x440] sm:$0xff] }
  0xd5   : > { %1411 = vst [vmem:[%s2089_s24 + $0x400] sm:$0xff] %v1155_v19  ;;  %v1158_v31 = vadd.f32 %v902_v21, %v389_v16  ;;  %v905_v33 = vmul.f32 %v2067_v2, %v648_v29  ;;  %v649_v35 = vld [vmem:[%s2059_s28 + $0x438] sm:$0xff]  ;;  %1412 = vst [vmem:[%s2089_s24 + $0x408] sm:$0xff] %v1156_v25  ;;  %v650_v39 = vld [vmem:[%s2059_s28 + $0x440] sm:$0xff] }
  0xd6   : > { %v1159_v37 = vadd.f32 %v903_v26, %v390_v22  ;;  %v906_v38 = vmul.f32 %v2067_v2, %v649_v35  ;;  %v395_v40 = vld [vmem:[%s2051_s5 + $0x448] sm:$0xff]  ;;  %1413 = vst [vmem:[%s2089_s24 + $0x410] sm:$0xff] %v1157_v30  ;;  %v1160_v42 = vadd.f32 %v904_v32, %v391_v24  ;;  %v907_v44 = vmul.f32 %v2067_v2, %v650_v39  ;;  %v396_v46 = vld [vmem:[%s2051_s5 + $0x450] sm:$0xff]  ;;  %v397_v48 = vld [vmem:[%s2051_s5 + $0x458] sm:$0xff] }
  0xd7   : > { %v651_v41 = vld [vmem:[%s2059_s28 + $0x448] sm:$0xff]  ;;  %1414 = vst [vmem:[%s2089_s24 + $0x418] sm:$0xff] %v1158_v31  ;;  %v1161_v43 = vadd.f32 %v905_v33, %v392_v28  ;;  %v652_v47 = vld [vmem:[%s2059_s28 + $0x450] sm:$0xff]  ;;  %v653_v51 = vld [vmem:[%s2059_s28 + $0x458] sm:$0xff] }
  0xd8   : > { %v908_v45 = vmul.f32 %v2067_v2, %v651_v41  ;;  %1415 = vst [vmem:[%s2089_s24 + $0x420] sm:$0xff] %v1159_v37  ;;  %v1162_v49 = vadd.f32 %v906_v38, %v393_v34  ;;  %v909_v50 = vmul.f32 %v2067_v2, %v652_v47  ;;  %v398_v52 = vld [vmem:[%s2051_s5 + $0x460] sm:$0xff]  ;;  %1416 = vst [vmem:[%s2089_s24 + $0x428] sm:$0xff] %v1160_v42  ;;  %v399_v58 = vld [vmem:[%s2051_s5 + $0x468] sm:$0xff] }
  0xd9   : > { %v654_v53 = vld [vmem:[%s2059_s28 + $0x460] sm:$0xff]  ;;  %1417 = vst [vmem:[%s2089_s24 + $0x430] sm:$0xff] %v1161_v43  ;;  %v1163_v54 = vadd.f32 %v907_v44, %v394_v36  ;;  %v910_v56 = vmul.f32 %v2067_v2, %v653_v51  ;;  %v655_v59 = vld [vmem:[%s2059_s28 + $0x468] sm:$0xff]  ;;  %v400_v60 = vld [vmem:[%s2051_s5 + $0x470] sm:$0xff] }
  0xda   : > { %v1164_v55 = vadd.f32 %v908_v45, %v395_v40  ;;  %v911_v57 = vmul.f32 %v2067_v2, %v654_v53  ;;  %1418 = vst [vmem:[%s2089_s24 + $0x438] sm:$0xff] %v1162_v49  ;;  %v1165_v61 = vadd.f32 %v909_v50, %v396_v46  ;;  %v912_v62 = vmul.f32 %v2067_v2, %v655_v59  ;;  %v656_v63 = vld [vmem:[%s2059_s28 + $0x470] sm:$0xff]  ;;  %v401_v0 = vld [vmem:[%s2051_s5 + $0x478] sm:$0xff]  ;;  %v402_v7 = vld [vmem:[%s2051_s5 + $0x480] sm:$0xff] }
  0xdb   : > { %v657_v1 = vld [vmem:[%s2059_s28 + $0x478] sm:$0xff]  ;;  %1419 = vst [vmem:[%s2089_s24 + $0x440] sm:$0xff] %v1163_v54  ;;  %v1166_v3 = vadd.f32 %v910_v56, %v397_v48  ;;  %v913_v5 = vmul.f32 %v2067_v2, %v656_v63  ;;  %v658_v8 = vld [vmem:[%s2059_s28 + $0x480] sm:$0xff]  ;;  %v403_v9 = vld [vmem:[%s2051_s5 + $0x488] sm:$0xff] }
  0xdc   : > { %1420 = vst [vmem:[%s2089_s24 + $0x448] sm:$0xff] %v1164_v55  ;;  %v1167_v4 = vadd.f32 %v911_v57, %v398_v52  ;;  %v914_v6 = vmul.f32 %v2067_v2, %v657_v1  ;;  %1421 = vst [vmem:[%s2089_s24 + $0x450] sm:$0xff] %v1165_v61  ;;  %v1168_v10 = vadd.f32 %v912_v62, %v399_v58  ;;  %v659_v12 = vld [vmem:[%s2059_s28 + $0x488] sm:$0xff]  ;;  %v404_v13 = vld [vmem:[%s2051_s5 + $0x490] sm:$0xff] }
  0xdd   : > { %v915_v11 = vmul.f32 %v2067_v2, %v658_v8  ;;  %v660_v14 = vld [vmem:[%s2059_s28 + $0x490] sm:$0xff]  ;;  %1422 = vst [vmem:[%s2089_s24 + $0x458] sm:$0xff] %v1166_v3  ;;  %v1169_v15 = vadd.f32 %v913_v5, %v400_v60  ;;  %v916_v17 = vmul.f32 %v2067_v2, %v659_v12  ;;  %v405_v19 = vld [vmem:[%s2051_s5 + $0x498] sm:$0xff]  ;;  %v406_v21 = vld [vmem:[%s2051_s5 + $0x4a0] sm:$0xff] }
  0xde   : > { %1423 = vst [vmem:[%s2089_s24 + $0x460] sm:$0xff] %v1167_v4  ;;  %v1170_v16 = vadd.f32 %v914_v6, %v401_v0  ;;  %v917_v18 = vmul.f32 %v2067_v2, %v660_v14  ;;  %v661_v20 = vld [vmem:[%s2059_s28 + $0x498] sm:$0xff]  ;;  %1424 = vst [vmem:[%s2089_s24 + $0x468] sm:$0xff] %v1168_v10  ;;  %v662_v24 = vld [vmem:[%s2059_s28 + $0x4a0] sm:$0xff] }
  0xdf   : > { %v1171_v22 = vadd.f32 %v915_v11, %v402_v7  ;;  %v918_v23 = vmul.f32 %v2067_v2, %v661_v20  ;;  %v407_v25 = vld [vmem:[%s2051_s5 + $0x4a8] sm:$0xff]  ;;  %1425 = vst [vmem:[%s2089_s24 + $0x470] sm:$0xff] %v1169_v15  ;;  %v1172_v27 = vadd.f32 %v916_v17, %v403_v9  ;;  %v919_v29 = vmul.f32 %v2067_v2, %v662_v24  ;;  %v408_v31 = vld [vmem:[%s2051_s5 + $0x4b0] sm:$0xff]  ;;  %v409_v33 = vld [vmem:[%s2051_s5 + $0x4b8] sm:$0xff] }
  0xe0   : > { %v663_v26 = vld [vmem:[%s2059_s28 + $0x4a8] sm:$0xff]  ;;  %1426 = vst [vmem:[%s2089_s24 + $0x478] sm:$0xff] %v1170_v16  ;;  %v1173_v28 = vadd.f32 %v917_v18, %v404_v13  ;;  %v664_v32 = vld [vmem:[%s2059_s28 + $0x4b0] sm:$0xff]  ;;  %v665_v36 = vld [vmem:[%s2059_s28 + $0x4b8] sm:$0xff] }
  0xe1   : > { %v920_v30 = vmul.f32 %v2067_v2, %v663_v26  ;;  %1427 = vst [vmem:[%s2089_s24 + $0x480] sm:$0xff] %v1171_v22  ;;  %v1174_v34 = vadd.f32 %v918_v23, %v405_v19  ;;  %v921_v35 = vmul.f32 %v2067_v2, %v664_v32  ;;  %v410_v37 = vld [vmem:[%s2051_s5 + $0x4c0] sm:$0xff]  ;;  %1428 = vst [vmem:[%s2089_s24 + $0x488] sm:$0xff] %v1172_v27  ;;  %v411_v43 = vld [vmem:[%s2051_s5 + $0x4c8] sm:$0xff] }
  0xe2   : > { %v666_v38 = vld [vmem:[%s2059_s28 + $0x4c0] sm:$0xff]  ;;  %1429 = vst [vmem:[%s2089_s24 + $0x490] sm:$0xff] %v1173_v28  ;;  %v1175_v39 = vadd.f32 %v919_v29, %v406_v21  ;;  %v922_v41 = vmul.f32 %v2067_v2, %v665_v36  ;;  %v667_v44 = vld [vmem:[%s2059_s28 + $0x4c8] sm:$0xff]  ;;  %v412_v45 = vld [vmem:[%s2051_s5 + $0x4d0] sm:$0xff] }
  0xe3   : > { %v1176_v40 = vadd.f32 %v920_v30, %v407_v25  ;;  %v923_v42 = vmul.f32 %v2067_v2, %v666_v38  ;;  %1430 = vst [vmem:[%s2089_s24 + $0x498] sm:$0xff] %v1174_v34  ;;  %v1177_v46 = vadd.f32 %v921_v35, %v408_v31  ;;  %v924_v47 = vmul.f32 %v2067_v2, %v667_v44  ;;  %v668_v48 = vld [vmem:[%s2059_s28 + $0x4d0] sm:$0xff]  ;;  %v413_v49 = vld [vmem:[%s2051_s5 + $0x4d8] sm:$0xff]  ;;  %v414_v55 = vld [vmem:[%s2051_s5 + $0x4e0] sm:$0xff] }
  0xe4   : > { %v669_v50 = vld [vmem:[%s2059_s28 + $0x4d8] sm:$0xff]  ;;  %1431 = vst [vmem:[%s2089_s24 + $0x4a0] sm:$0xff] %v1175_v39  ;;  %v1178_v51 = vadd.f32 %v922_v41, %v409_v33  ;;  %v925_v53 = vmul.f32 %v2067_v2, %v668_v48  ;;  %v670_v56 = vld [vmem:[%s2059_s28 + $0x4e0] sm:$0xff]  ;;  %v415_v57 = vld [vmem:[%s2051_s5 + $0x4e8] sm:$0xff] }
  0xe5   : > { %1432 = vst [vmem:[%s2089_s24 + $0x4a8] sm:$0xff] %v1176_v40  ;;  %v1179_v52 = vadd.f32 %v923_v42, %v410_v37  ;;  %v926_v54 = vmul.f32 %v2067_v2, %v669_v50  ;;  %1433 = vst [vmem:[%s2089_s24 + $0x4b0] sm:$0xff] %v1177_v46  ;;  %v1180_v58 = vadd.f32 %v924_v47, %v411_v43  ;;  %v671_v60 = vld [vmem:[%s2059_s28 + $0x4e8] sm:$0xff]  ;;  %v416_v61 = vld [vmem:[%s2051_s5 + $0x4f0] sm:$0xff] }
  0xe6   : > { %v927_v59 = vmul.f32 %v2067_v2, %v670_v56  ;;  %v672_v62 = vld [vmem:[%s2059_s28 + $0x4f0] sm:$0xff]  ;;  %1434 = vst [vmem:[%s2089_s24 + $0x4b8] sm:$0xff] %v1178_v51  ;;  %v1181_v63 = vadd.f32 %v925_v53, %v412_v45  ;;  %v928_v1 = vmul.f32 %v2067_v2, %v671_v60  ;;  %v417_v4 = vld [vmem:[%s2051_s5 + $0x4f8] sm:$0xff]  ;;  %v418_v6 = vld [vmem:[%s2051_s5 + $0x500] sm:$0xff] }
  0xe7   : > { %1435 = vst [vmem:[%s2089_s24 + $0x4c0] sm:$0xff] %v1179_v52  ;;  %v1182_v0 = vadd.f32 %v926_v54, %v413_v49  ;;  %v929_v3 = vmul.f32 %v2067_v2, %v672_v62  ;;  %v673_v5 = vld [vmem:[%s2059_s28 + $0x4f8] sm:$0xff]  ;;  %1436 = vst [vmem:[%s2089_s24 + $0x4c8] sm:$0xff] %v1180_v58  ;;  %v674_v9 = vld [vmem:[%s2059_s28 + $0x500] sm:$0xff] }
  0xe8   : > { %v1183_v7 = vadd.f32 %v927_v59, %v414_v55  ;;  %v930_v8 = vmul.f32 %v2067_v2, %v673_v5  ;;  %v419_v10 = vld [vmem:[%s2051_s5 + $0x508] sm:$0xff]  ;;  %1437 = vst [vmem:[%s2089_s24 + $0x4d0] sm:$0xff] %v1181_v63  ;;  %v1184_v12 = vadd.f32 %v928_v1, %v415_v57  ;;  %v931_v14 = vmul.f32 %v2067_v2, %v674_v9  ;;  %v420_v16 = vld [vmem:[%s2051_s5 + $0x510] sm:$0xff]  ;;  %v421_v18 = vld [vmem:[%s2051_s5 + $0x518] sm:$0xff] }
  0xe9   : > { %v675_v11 = vld [vmem:[%s2059_s28 + $0x508] sm:$0xff]  ;;  %1438 = vst [vmem:[%s2089_s24 + $0x4d8] sm:$0xff] %v1182_v0  ;;  %v1185_v13 = vadd.f32 %v929_v3, %v416_v61  ;;  %v676_v17 = vld [vmem:[%s2059_s28 + $0x510] sm:$0xff]  ;;  %v677_v21 = vld [vmem:[%s2059_s28 + $0x518] sm:$0xff] }
  0xea   : > { %v932_v15 = vmul.f32 %v2067_v2, %v675_v11  ;;  %1439 = vst [vmem:[%s2089_s24 + $0x4e0] sm:$0xff] %v1183_v7  ;;  %v1186_v19 = vadd.f32 %v930_v8, %v417_v4  ;;  %v933_v20 = vmul.f32 %v2067_v2, %v676_v17  ;;  %v422_v22 = vld [vmem:[%s2051_s5 + $0x520] sm:$0xff]  ;;  %1440 = vst [vmem:[%s2089_s24 + $0x4e8] sm:$0xff] %v1184_v12  ;;  %v423_v28 = vld [vmem:[%s2051_s5 + $0x528] sm:$0xff] }
  0xeb   : > { %v678_v23 = vld [vmem:[%s2059_s28 + $0x520] sm:$0xff]  ;;  %1441 = vst [vmem:[%s2089_s24 + $0x4f0] sm:$0xff] %v1185_v13  ;;  %v1187_v24 = vadd.f32 %v931_v14, %v418_v6  ;;  %v934_v26 = vmul.f32 %v2067_v2, %v677_v21  ;;  %v679_v29 = vld [vmem:[%s2059_s28 + $0x528] sm:$0xff]  ;;  %v424_v30 = vld [vmem:[%s2051_s5 + $0x530] sm:$0xff] }
  0xec   : > { %v1188_v25 = vadd.f32 %v932_v15, %v419_v10  ;;  %v935_v27 = vmul.f32 %v2067_v2, %v678_v23  ;;  %1442 = vst [vmem:[%s2089_s24 + $0x4f8] sm:$0xff] %v1186_v19  ;;  %v1189_v31 = vadd.f32 %v933_v20, %v420_v16  ;;  %v936_v32 = vmul.f32 %v2067_v2, %v679_v29  ;;  %v680_v33 = vld [vmem:[%s2059_s28 + $0x530] sm:$0xff]  ;;  %v425_v34 = vld [vmem:[%s2051_s5 + $0x538] sm:$0xff]  ;;  %v426_v40 = vld [vmem:[%s2051_s5 + $0x540] sm:$0xff] }
  0xed   : > { %v681_v35 = vld [vmem:[%s2059_s28 + $0x538] sm:$0xff]  ;;  %1443 = vst [vmem:[%s2089_s24 + $0x500] sm:$0xff] %v1187_v24  ;;  %v1190_v36 = vadd.f32 %v934_v26, %v421_v18  ;;  %v937_v38 = vmul.f32 %v2067_v2, %v680_v33  ;;  %v682_v41 = vld [vmem:[%s2059_s28 + $0x540] sm:$0xff]  ;;  %v427_v42 = vld [vmem:[%s2051_s5 + $0x548] sm:$0xff] }
  0xee   : > { %1444 = vst [vmem:[%s2089_s24 + $0x508] sm:$0xff] %v1188_v25  ;;  %v1191_v37 = vadd.f32 %v935_v27, %v422_v22  ;;  %v938_v39 = vmul.f32 %v2067_v2, %v681_v35  ;;  %1445 = vst [vmem:[%s2089_s24 + $0x510] sm:$0xff] %v1189_v31  ;;  %v1192_v43 = vadd.f32 %v936_v32, %v423_v28  ;;  %v683_v45 = vld [vmem:[%s2059_s28 + $0x548] sm:$0xff]  ;;  %v428_v46 = vld [vmem:[%s2051_s5 + $0x550] sm:$0xff] }
  0xef   : > { %v939_v44 = vmul.f32 %v2067_v2, %v682_v41  ;;  %v684_v47 = vld [vmem:[%s2059_s28 + $0x550] sm:$0xff]  ;;  %1446 = vst [vmem:[%s2089_s24 + $0x518] sm:$0xff] %v1190_v36  ;;  %v1193_v48 = vadd.f32 %v937_v38, %v424_v30  ;;  %v940_v50 = vmul.f32 %v2067_v2, %v683_v45  ;;  %v429_v52 = vld [vmem:[%s2051_s5 + $0x558] sm:$0xff]  ;;  %v430_v54 = vld [vmem:[%s2051_s5 + $0x560] sm:$0xff] }
  0xf0   : > { %1447 = vst [vmem:[%s2089_s24 + $0x520] sm:$0xff] %v1191_v37  ;;  %v1194_v49 = vadd.f32 %v938_v39, %v425_v34  ;;  %v941_v51 = vmul.f32 %v2067_v2, %v684_v47  ;;  %v685_v53 = vld [vmem:[%s2059_s28 + $0x558] sm:$0xff]  ;;  %1448 = vst [vmem:[%s2089_s24 + $0x528] sm:$0xff] %v1192_v43  ;;  %v686_v57 = vld [vmem:[%s2059_s28 + $0x560] sm:$0xff] }
  0xf1   : > { %v1195_v55 = vadd.f32 %v939_v44, %v426_v40  ;;  %v942_v56 = vmul.f32 %v2067_v2, %v685_v53  ;;  %v431_v58 = vld [vmem:[%s2051_s5 + $0x568] sm:$0xff]  ;;  %1449 = vst [vmem:[%s2089_s24 + $0x530] sm:$0xff] %v1193_v48  ;;  %v1196_v60 = vadd.f32 %v940_v50, %v427_v42  ;;  %v943_v62 = vmul.f32 %v2067_v2, %v686_v57  ;;  %v432_v0 = vld [vmem:[%s2051_s5 + $0x570] sm:$0xff]  ;;  %v433_v3 = vld [vmem:[%s2051_s5 + $0x578] sm:$0xff] }
  0xf2   : > { %v687_v59 = vld [vmem:[%s2059_s28 + $0x568] sm:$0xff]  ;;  %1450 = vst [vmem:[%s2089_s24 + $0x538] sm:$0xff] %v1194_v49  ;;  %v1197_v61 = vadd.f32 %v941_v51, %v428_v46  ;;  %v688_v1 = vld [vmem:[%s2059_s28 + $0x570] sm:$0xff]  ;;  %v689_v6 = vld [vmem:[%s2059_s28 + $0x578] sm:$0xff] }
  0xf3   : > { %v944_v63 = vmul.f32 %v2067_v2, %v687_v59  ;;  %1451 = vst [vmem:[%s2089_s24 + $0x540] sm:$0xff] %v1195_v55  ;;  %v1198_v4 = vadd.f32 %v942_v56, %v429_v52  ;;  %v945_v5 = vmul.f32 %v2067_v2, %v688_v1  ;;  %v434_v7 = vld [vmem:[%s2051_s5 + $0x580] sm:$0xff]  ;;  %1452 = vst [vmem:[%s2089_s24 + $0x548] sm:$0xff] %v1196_v60  ;;  %v435_v13 = vld [vmem:[%s2051_s5 + $0x588] sm:$0xff] }
  0xf4   : > { %v690_v8 = vld [vmem:[%s2059_s28 + $0x580] sm:$0xff]  ;;  %1453 = vst [vmem:[%s2089_s24 + $0x550] sm:$0xff] %v1197_v61  ;;  %v1199_v9 = vadd.f32 %v943_v62, %v430_v54  ;;  %v946_v11 = vmul.f32 %v2067_v2, %v689_v6  ;;  %v691_v14 = vld [vmem:[%s2059_s28 + $0x588] sm:$0xff]  ;;  %v436_v15 = vld [vmem:[%s2051_s5 + $0x590] sm:$0xff] }
  0xf5   : > { %v1200_v10 = vadd.f32 %v944_v63, %v431_v58  ;;  %v947_v12 = vmul.f32 %v2067_v2, %v690_v8  ;;  %1454 = vst [vmem:[%s2089_s24 + $0x558] sm:$0xff] %v1198_v4  ;;  %v1201_v16 = vadd.f32 %v945_v5, %v432_v0  ;;  %v948_v17 = vmul.f32 %v2067_v2, %v691_v14  ;;  %v692_v18 = vld [vmem:[%s2059_s28 + $0x590] sm:$0xff]  ;;  %v437_v19 = vld [vmem:[%s2051_s5 + $0x598] sm:$0xff]  ;;  %v438_v25 = vld [vmem:[%s2051_s5 + $0x5a0] sm:$0xff] }
  0xf6   : > { %v693_v20 = vld [vmem:[%s2059_s28 + $0x598] sm:$0xff]  ;;  %1455 = vst [vmem:[%s2089_s24 + $0x560] sm:$0xff] %v1199_v9  ;;  %v1202_v21 = vadd.f32 %v946_v11, %v433_v3  ;;  %v949_v23 = vmul.f32 %v2067_v2, %v692_v18  ;;  %v694_v26 = vld [vmem:[%s2059_s28 + $0x5a0] sm:$0xff]  ;;  %v439_v27 = vld [vmem:[%s2051_s5 + $0x5a8] sm:$0xff] }
  0xf7   : > { %1456 = vst [vmem:[%s2089_s24 + $0x568] sm:$0xff] %v1200_v10  ;;  %v1203_v22 = vadd.f32 %v947_v12, %v434_v7  ;;  %v950_v24 = vmul.f32 %v2067_v2, %v693_v20  ;;  %1457 = vst [vmem:[%s2089_s24 + $0x570] sm:$0xff] %v1201_v16  ;;  %v1204_v28 = vadd.f32 %v948_v17, %v435_v13  ;;  %v695_v30 = vld [vmem:[%s2059_s28 + $0x5a8] sm:$0xff]  ;;  %v440_v31 = vld [vmem:[%s2051_s5 + $0x5b0] sm:$0xff] }
  0xf8   : > { %v951_v29 = vmul.f32 %v2067_v2, %v694_v26  ;;  %v696_v32 = vld [vmem:[%s2059_s28 + $0x5b0] sm:$0xff]  ;;  %1458 = vst [vmem:[%s2089_s24 + $0x578] sm:$0xff] %v1202_v21  ;;  %v1205_v33 = vadd.f32 %v949_v23, %v436_v15  ;;  %v952_v35 = vmul.f32 %v2067_v2, %v695_v30  ;;  %v441_v37 = vld [vmem:[%s2051_s5 + $0x5b8] sm:$0xff]  ;;  %v442_v39 = vld [vmem:[%s2051_s5 + $0x5c0] sm:$0xff] }
  0xf9   : > { %1459 = vst [vmem:[%s2089_s24 + $0x580] sm:$0xff] %v1203_v22  ;;  %v1206_v34 = vadd.f32 %v950_v24, %v437_v19  ;;  %v953_v36 = vmul.f32 %v2067_v2, %v696_v32  ;;  %v697_v38 = vld [vmem:[%s2059_s28 + $0x5b8] sm:$0xff]  ;;  %1460 = vst [vmem:[%s2089_s24 + $0x588] sm:$0xff] %v1204_v28  ;;  %v698_v42 = vld [vmem:[%s2059_s28 + $0x5c0] sm:$0xff] }
  0xfa   : > { %v1207_v40 = vadd.f32 %v951_v29, %v438_v25  ;;  %v954_v41 = vmul.f32 %v2067_v2, %v697_v38  ;;  %v443_v43 = vld [vmem:[%s2051_s5 + $0x5c8] sm:$0xff]  ;;  %1461 = vst [vmem:[%s2089_s24 + $0x590] sm:$0xff] %v1205_v33  ;;  %v1208_v45 = vadd.f32 %v952_v35, %v439_v27  ;;  %v955_v47 = vmul.f32 %v2067_v2, %v698_v42  ;;  %v444_v49 = vld [vmem:[%s2051_s5 + $0x5d0] sm:$0xff]  ;;  %v445_v51 = vld [vmem:[%s2051_s5 + $0x5d8] sm:$0xff] }
  0xfb   : > { %v699_v44 = vld [vmem:[%s2059_s28 + $0x5c8] sm:$0xff]  ;;  %1462 = vst [vmem:[%s2089_s24 + $0x598] sm:$0xff] %v1206_v34  ;;  %v1209_v46 = vadd.f32 %v953_v36, %v440_v31  ;;  %v700_v50 = vld [vmem:[%s2059_s28 + $0x5d0] sm:$0xff]  ;;  %v701_v54 = vld [vmem:[%s2059_s28 + $0x5d8] sm:$0xff] }
  0xfc   : > { %v956_v48 = vmul.f32 %v2067_v2, %v699_v44  ;;  %1463 = vst [vmem:[%s2089_s24 + $0x5a0] sm:$0xff] %v1207_v40  ;;  %v1210_v52 = vadd.f32 %v954_v41, %v441_v37  ;;  %v957_v53 = vmul.f32 %v2067_v2, %v700_v50  ;;  %v446_v55 = vld [vmem:[%s2051_s5 + $0x5e0] sm:$0xff]  ;;  %1464 = vst [vmem:[%s2089_s24 + $0x5a8] sm:$0xff] %v1208_v45  ;;  %v447_v61 = vld [vmem:[%s2051_s5 + $0x5e8] sm:$0xff] }
  0xfd   : > { %v702_v56 = vld [vmem:[%s2059_s28 + $0x5e0] sm:$0xff]  ;;  %1465 = vst [vmem:[%s2089_s24 + $0x5b0] sm:$0xff] %v1209_v46  ;;  %v1211_v57 = vadd.f32 %v955_v47, %v442_v39  ;;  %v958_v59 = vmul.f32 %v2067_v2, %v701_v54  ;;  %v703_v62 = vld [vmem:[%s2059_s28 + $0x5e8] sm:$0xff]  ;;  %v448_v63 = vld [vmem:[%s2051_s5 + $0x5f0] sm:$0xff] }
  0xfe   : > { %v1212_v58 = vadd.f32 %v956_v48, %v443_v43  ;;  %v959_v60 = vmul.f32 %v2067_v2, %v702_v56  ;;  %1466 = vst [vmem:[%s2089_s24 + $0x5b8] sm:$0xff] %v1210_v52  ;;  %v1213_v0 = vadd.f32 %v957_v53, %v444_v49  ;;  %v960_v1 = vmul.f32 %v2067_v2, %v703_v62  ;;  %v704_v3 = vld [vmem:[%s2059_s28 + $0x5f0] sm:$0xff]  ;;  %v449_v4 = vld [vmem:[%s2051_s5 + $0x5f8] sm:$0xff]  ;;  %v450_v10 = vld [vmem:[%s2051_s5 + $0x600] sm:$0xff] }
  0xff   : > { %v705_v5 = vld [vmem:[%s2059_s28 + $0x5f8] sm:$0xff]  ;;  %1467 = vst [vmem:[%s2089_s24 + $0x5c0] sm:$0xff] %v1211_v57  ;;  %v1214_v6 = vadd.f32 %v958_v59, %v445_v51  ;;  %v961_v8 = vmul.f32 %v2067_v2, %v704_v3  ;;  %v706_v11 = vld [vmem:[%s2059_s28 + $0x600] sm:$0xff]  ;;  %v451_v12 = vld [vmem:[%s2051_s5 + $0x608] sm:$0xff] }
 0x100   : > { %1468 = vst [vmem:[%s2089_s24 + $0x5c8] sm:$0xff] %v1212_v58  ;;  %v1215_v7 = vadd.f32 %v959_v60, %v446_v55  ;;  %v962_v9 = vmul.f32 %v2067_v2, %v705_v5  ;;  %1469 = vst [vmem:[%s2089_s24 + $0x5d0] sm:$0xff] %v1213_v0  ;;  %v1216_v13 = vadd.f32 %v960_v1, %v447_v61  ;;  %v707_v15 = vld [vmem:[%s2059_s28 + $0x608] sm:$0xff]  ;;  %v452_v16 = vld [vmem:[%s2051_s5 + $0x610] sm:$0xff] }
 0x101   : > { %v963_v14 = vmul.f32 %v2067_v2, %v706_v11  ;;  %v708_v17 = vld [vmem:[%s2059_s28 + $0x610] sm:$0xff]  ;;  %1470 = vst [vmem:[%s2089_s24 + $0x5d8] sm:$0xff] %v1214_v6  ;;  %v1217_v18 = vadd.f32 %v961_v8, %v448_v63  ;;  %v964_v20 = vmul.f32 %v2067_v2, %v707_v15  ;;  %v453_v22 = vld [vmem:[%s2051_s5 + $0x618] sm:$0xff]  ;;  %v454_v24 = vld [vmem:[%s2051_s5 + $0x620] sm:$0xff] }
 0x102   : > { %1471 = vst [vmem:[%s2089_s24 + $0x5e0] sm:$0xff] %v1215_v7  ;;  %v1218_v19 = vadd.f32 %v962_v9, %v449_v4  ;;  %v965_v21 = vmul.f32 %v2067_v2, %v708_v17  ;;  %v709_v23 = vld [vmem:[%s2059_s28 + $0x618] sm:$0xff]  ;;  %1472 = vst [vmem:[%s2089_s24 + $0x5e8] sm:$0xff] %v1216_v13  ;;  %v710_v27 = vld [vmem:[%s2059_s28 + $0x620] sm:$0xff] }
 0x103   : > { %v1219_v25 = vadd.f32 %v963_v14, %v450_v10  ;;  %v966_v26 = vmul.f32 %v2067_v2, %v709_v23  ;;  %v455_v28 = vld [vmem:[%s2051_s5 + $0x628] sm:$0xff]  ;;  %1473 = vst [vmem:[%s2089_s24 + $0x5f0] sm:$0xff] %v1217_v18  ;;  %v1220_v30 = vadd.f32 %v964_v20, %v451_v12  ;;  %v967_v32 = vmul.f32 %v2067_v2, %v710_v27  ;;  %v456_v34 = vld [vmem:[%s2051_s5 + $0x630] sm:$0xff]  ;;  %v457_v36 = vld [vmem:[%s2051_s5 + $0x638] sm:$0xff] }
 0x104   : > { %v711_v29 = vld [vmem:[%s2059_s28 + $0x628] sm:$0xff]  ;;  %1474 = vst [vmem:[%s2089_s24 + $0x5f8] sm:$0xff] %v1218_v19  ;;  %v1221_v31 = vadd.f32 %v965_v21, %v452_v16  ;;  %v712_v35 = vld [vmem:[%s2059_s28 + $0x630] sm:$0xff]  ;;  %v713_v39 = vld [vmem:[%s2059_s28 + $0x638] sm:$0xff] }
 0x105   : > { %v968_v33 = vmul.f32 %v2067_v2, %v711_v29  ;;  %1475 = vst [vmem:[%s2089_s24 + $0x600] sm:$0xff] %v1219_v25  ;;  %v1222_v37 = vadd.f32 %v966_v26, %v453_v22  ;;  %v969_v38 = vmul.f32 %v2067_v2, %v712_v35  ;;  %v458_v40 = vld [vmem:[%s2051_s5 + $0x640] sm:$0xff]  ;;  %1476 = vst [vmem:[%s2089_s24 + $0x608] sm:$0xff] %v1220_v30  ;;  %v459_v46 = vld [vmem:[%s2051_s5 + $0x648] sm:$0xff] }
 0x106   : > { %v714_v41 = vld [vmem:[%s2059_s28 + $0x640] sm:$0xff]  ;;  %1477 = vst [vmem:[%s2089_s24 + $0x610] sm:$0xff] %v1221_v31  ;;  %v1223_v42 = vadd.f32 %v967_v32, %v454_v24  ;;  %v970_v44 = vmul.f32 %v2067_v2, %v713_v39  ;;  %v715_v47 = vld [vmem:[%s2059_s28 + $0x648] sm:$0xff]  ;;  %v460_v48 = vld [vmem:[%s2051_s5 + $0x650] sm:$0xff] }
 0x107   : > { %v1224_v43 = vadd.f32 %v968_v33, %v455_v28  ;;  %v971_v45 = vmul.f32 %v2067_v2, %v714_v41  ;;  %1478 = vst [vmem:[%s2089_s24 + $0x618] sm:$0xff] %v1222_v37  ;;  %v1225_v49 = vadd.f32 %v969_v38, %v456_v34  ;;  %v972_v50 = vmul.f32 %v2067_v2, %v715_v47  ;;  %v716_v51 = vld [vmem:[%s2059_s28 + $0x650] sm:$0xff]  ;;  %v461_v52 = vld [vmem:[%s2051_s5 + $0x658] sm:$0xff]  ;;  %v462_v58 = vld [vmem:[%s2051_s5 + $0x660] sm:$0xff] }
 0x108   : > { %v717_v53 = vld [vmem:[%s2059_s28 + $0x658] sm:$0xff]  ;;  %1479 = vst [vmem:[%s2089_s24 + $0x620] sm:$0xff] %v1223_v42  ;;  %v1226_v54 = vadd.f32 %v970_v44, %v457_v36  ;;  %v973_v56 = vmul.f32 %v2067_v2, %v716_v51  ;;  %v718_v59 = vld [vmem:[%s2059_s28 + $0x660] sm:$0xff]  ;;  %v463_v60 = vld [vmem:[%s2051_s5 + $0x668] sm:$0xff] }
 0x109   : > { %1480 = vst [vmem:[%s2089_s24 + $0x628] sm:$0xff] %v1224_v43  ;;  %v1227_v55 = vadd.f32 %v971_v45, %v458_v40  ;;  %v974_v57 = vmul.f32 %v2067_v2, %v717_v53  ;;  %1481 = vst [vmem:[%s2089_s24 + $0x630] sm:$0xff] %v1225_v49  ;;  %v1228_v61 = vadd.f32 %v972_v50, %v459_v46  ;;  %v719_v63 = vld [vmem:[%s2059_s28 + $0x668] sm:$0xff]  ;;  %v464_v0 = vld [vmem:[%s2051_s5 + $0x670] sm:$0xff] }
 0x10a   : > { %v975_v62 = vmul.f32 %v2067_v2, %v718_v59  ;;  %v720_v1 = vld [vmem:[%s2059_s28 + $0x670] sm:$0xff]  ;;  %1482 = vst [vmem:[%s2089_s24 + $0x638] sm:$0xff] %v1226_v54  ;;  %v1229_v3 = vadd.f32 %v973_v56, %v460_v48  ;;  %v976_v5 = vmul.f32 %v2067_v2, %v719_v63  ;;  %v465_v7 = vld [vmem:[%s2051_s5 + $0x678] sm:$0xff]  ;;  %v466_v9 = vld [vmem:[%s2051_s5 + $0x680] sm:$0xff] }
 0x10b   : > { %1483 = vst [vmem:[%s2089_s24 + $0x640] sm:$0xff] %v1227_v55  ;;  %v1230_v4 = vadd.f32 %v974_v57, %v461_v52  ;;  %v977_v6 = vmul.f32 %v2067_v2, %v720_v1  ;;  %v721_v8 = vld [vmem:[%s2059_s28 + $0x678] sm:$0xff]  ;;  %1484 = vst [vmem:[%s2089_s24 + $0x648] sm:$0xff] %v1228_v61  ;;  %v722_v12 = vld [vmem:[%s2059_s28 + $0x680] sm:$0xff] }
 0x10c   : > { %v1231_v10 = vadd.f32 %v975_v62, %v462_v58  ;;  %v978_v11 = vmul.f32 %v2067_v2, %v721_v8  ;;  %v467_v13 = vld [vmem:[%s2051_s5 + $0x688] sm:$0xff]  ;;  %1485 = vst [vmem:[%s2089_s24 + $0x650] sm:$0xff] %v1229_v3  ;;  %v1232_v15 = vadd.f32 %v976_v5, %v463_v60  ;;  %v979_v17 = vmul.f32 %v2067_v2, %v722_v12  ;;  %v468_v19 = vld [vmem:[%s2051_s5 + $0x690] sm:$0xff]  ;;  %v469_v21 = vld [vmem:[%s2051_s5 + $0x698] sm:$0xff] }
 0x10d   : > { %v723_v14 = vld [vmem:[%s2059_s28 + $0x688] sm:$0xff]  ;;  %1486 = vst [vmem:[%s2089_s24 + $0x658] sm:$0xff] %v1230_v4  ;;  %v1233_v16 = vadd.f32 %v977_v6, %v464_v0  ;;  %v724_v20 = vld [vmem:[%s2059_s28 + $0x690] sm:$0xff]  ;;  %v725_v24 = vld [vmem:[%s2059_s28 + $0x698] sm:$0xff] }
 0x10e   : > { %v980_v18 = vmul.f32 %v2067_v2, %v723_v14  ;;  %1487 = vst [vmem:[%s2089_s24 + $0x660] sm:$0xff] %v1231_v10  ;;  %v1234_v22 = vadd.f32 %v978_v11, %v465_v7  ;;  %v981_v23 = vmul.f32 %v2067_v2, %v724_v20  ;;  %v470_v25 = vld [vmem:[%s2051_s5 + $0x6a0] sm:$0xff]  ;;  %1488 = vst [vmem:[%s2089_s24 + $0x668] sm:$0xff] %v1232_v15  ;;  %v471_v31 = vld [vmem:[%s2051_s5 + $0x6a8] sm:$0xff] }
 0x10f   : > { %v726_v26 = vld [vmem:[%s2059_s28 + $0x6a0] sm:$0xff]  ;;  %1489 = vst [vmem:[%s2089_s24 + $0x670] sm:$0xff] %v1233_v16  ;;  %v1235_v27 = vadd.f32 %v979_v17, %v466_v9  ;;  %v982_v29 = vmul.f32 %v2067_v2, %v725_v24  ;;  %v727_v32 = vld [vmem:[%s2059_s28 + $0x6a8] sm:$0xff]  ;;  %v472_v33 = vld [vmem:[%s2051_s5 + $0x6b0] sm:$0xff] }
 0x110   : > { %v1236_v28 = vadd.f32 %v980_v18, %v467_v13  ;;  %v983_v30 = vmul.f32 %v2067_v2, %v726_v26  ;;  %1490 = vst [vmem:[%s2089_s24 + $0x678] sm:$0xff] %v1234_v22  ;;  %v1237_v34 = vadd.f32 %v981_v23, %v468_v19  ;;  %v984_v35 = vmul.f32 %v2067_v2, %v727_v32  ;;  %v728_v36 = vld [vmem:[%s2059_s28 + $0x6b0] sm:$0xff]  ;;  %v473_v37 = vld [vmem:[%s2051_s5 + $0x6b8] sm:$0xff]  ;;  %v474_v43 = vld [vmem:[%s2051_s5 + $0x6c0] sm:$0xff] }
 0x111   : > { %v729_v38 = vld [vmem:[%s2059_s28 + $0x6b8] sm:$0xff]  ;;  %1491 = vst [vmem:[%s2089_s24 + $0x680] sm:$0xff] %v1235_v27  ;;  %v1238_v39 = vadd.f32 %v982_v29, %v469_v21  ;;  %v985_v41 = vmul.f32 %v2067_v2, %v728_v36  ;;  %v730_v44 = vld [vmem:[%s2059_s28 + $0x6c0] sm:$0xff]  ;;  %v475_v45 = vld [vmem:[%s2051_s5 + $0x6c8] sm:$0xff] }
 0x112   : > { %1492 = vst [vmem:[%s2089_s24 + $0x688] sm:$0xff] %v1236_v28  ;;  %v1239_v40 = vadd.f32 %v983_v30, %v470_v25  ;;  %v986_v42 = vmul.f32 %v2067_v2, %v729_v38  ;;  %1493 = vst [vmem:[%s2089_s24 + $0x690] sm:$0xff] %v1237_v34  ;;  %v1240_v46 = vadd.f32 %v984_v35, %v471_v31  ;;  %v731_v48 = vld [vmem:[%s2059_s28 + $0x6c8] sm:$0xff]  ;;  %v476_v49 = vld [vmem:[%s2051_s5 + $0x6d0] sm:$0xff] }
 0x113   : > { %v987_v47 = vmul.f32 %v2067_v2, %v730_v44  ;;  %v732_v50 = vld [vmem:[%s2059_s28 + $0x6d0] sm:$0xff]  ;;  %1494 = vst [vmem:[%s2089_s24 + $0x698] sm:$0xff] %v1238_v39  ;;  %v1241_v51 = vadd.f32 %v985_v41, %v472_v33  ;;  %v988_v53 = vmul.f32 %v2067_v2, %v731_v48  ;;  %v477_v55 = vld [vmem:[%s2051_s5 + $0x6d8] sm:$0xff]  ;;  %v478_v57 = vld [vmem:[%s2051_s5 + $0x6e0] sm:$0xff] }
 0x114   : > { %1495 = vst [vmem:[%s2089_s24 + $0x6a0] sm:$0xff] %v1239_v40  ;;  %v1242_v52 = vadd.f32 %v986_v42, %v473_v37  ;;  %v989_v54 = vmul.f32 %v2067_v2, %v732_v50  ;;  %v733_v56 = vld [vmem:[%s2059_s28 + $0x6d8] sm:$0xff]  ;;  %1496 = vst [vmem:[%s2089_s24 + $0x6a8] sm:$0xff] %v1240_v46  ;;  %v734_v60 = vld [vmem:[%s2059_s28 + $0x6e0] sm:$0xff] }
 0x115   : > { %v1243_v58 = vadd.f32 %v987_v47, %v474_v43  ;;  %v990_v59 = vmul.f32 %v2067_v2, %v733_v56  ;;  %v479_v61 = vld [vmem:[%s2051_s5 + $0x6e8] sm:$0xff]  ;;  %1497 = vst [vmem:[%s2089_s24 + $0x6b0] sm:$0xff] %v1241_v51  ;;  %v1244_v63 = vadd.f32 %v988_v53, %v475_v45  ;;  %v991_v1 = vmul.f32 %v2067_v2, %v734_v60  ;;  %v480_v4 = vld [vmem:[%s2051_s5 + $0x6f0] sm:$0xff]  ;;  %v481_v6 = vld [vmem:[%s2051_s5 + $0x6f8] sm:$0xff] }
 0x116   : > { %v735_v62 = vld [vmem:[%s2059_s28 + $0x6e8] sm:$0xff]  ;;  %1498 = vst [vmem:[%s2089_s24 + $0x6b8] sm:$0xff] %v1242_v52  ;;  %v1245_v0 = vadd.f32 %v989_v54, %v476_v49  ;;  %v736_v5 = vld [vmem:[%s2059_s28 + $0x6f0] sm:$0xff]  ;;  %v737_v9 = vld [vmem:[%s2059_s28 + $0x6f8] sm:$0xff] }
 0x117   : > { %v992_v3 = vmul.f32 %v2067_v2, %v735_v62  ;;  %1499 = vst [vmem:[%s2089_s24 + $0x6c0] sm:$0xff] %v1243_v58  ;;  %v1246_v7 = vadd.f32 %v990_v59, %v477_v55  ;;  %v993_v8 = vmul.f32 %v2067_v2, %v736_v5  ;;  %v482_v10 = vld [vmem:[%s2051_s5 + $0x700] sm:$0xff]  ;;  %1500 = vst [vmem:[%s2089_s24 + $0x6c8] sm:$0xff] %v1244_v63  ;;  %v483_v16 = vld [vmem:[%s2051_s5 + $0x708] sm:$0xff] }
 0x118   : > { %v738_v11 = vld [vmem:[%s2059_s28 + $0x700] sm:$0xff]  ;;  %1501 = vst [vmem:[%s2089_s24 + $0x6d0] sm:$0xff] %v1245_v0  ;;  %v1247_v12 = vadd.f32 %v991_v1, %v478_v57  ;;  %v994_v14 = vmul.f32 %v2067_v2, %v737_v9  ;;  %v739_v17 = vld [vmem:[%s2059_s28 + $0x708] sm:$0xff]  ;;  %v484_v18 = vld [vmem:[%s2051_s5 + $0x710] sm:$0xff] }
 0x119   : > { %v1248_v13 = vadd.f32 %v992_v3, %v479_v61  ;;  %v995_v15 = vmul.f32 %v2067_v2, %v738_v11  ;;  %1502 = vst [vmem:[%s2089_s24 + $0x6d8] sm:$0xff] %v1246_v7  ;;  %v1249_v19 = vadd.f32 %v993_v8, %v480_v4  ;;  %v996_v20 = vmul.f32 %v2067_v2, %v739_v17  ;;  %v740_v21 = vld [vmem:[%s2059_s28 + $0x710] sm:$0xff]  ;;  %v485_v22 = vld [vmem:[%s2051_s5 + $0x718] sm:$0xff]  ;;  %v486_v28 = vld [vmem:[%s2051_s5 + $0x720] sm:$0xff] }
 0x11a   : > { %v741_v23 = vld [vmem:[%s2059_s28 + $0x718] sm:$0xff]  ;;  %1503 = vst [vmem:[%s2089_s24 + $0x6e0] sm:$0xff] %v1247_v12  ;;  %v1250_v24 = vadd.f32 %v994_v14, %v481_v6  ;;  %v997_v26 = vmul.f32 %v2067_v2, %v740_v21  ;;  %v742_v29 = vld [vmem:[%s2059_s28 + $0x720] sm:$0xff]  ;;  %v487_v30 = vld [vmem:[%s2051_s5 + $0x728] sm:$0xff] }
 0x11b   : > { %1504 = vst [vmem:[%s2089_s24 + $0x6e8] sm:$0xff] %v1248_v13  ;;  %v1251_v25 = vadd.f32 %v995_v15, %v482_v10  ;;  %v998_v27 = vmul.f32 %v2067_v2, %v741_v23  ;;  %1505 = vst [vmem:[%s2089_s24 + $0x6f0] sm:$0xff] %v1249_v19  ;;  %v1252_v31 = vadd.f32 %v996_v20, %v483_v16  ;;  %v743_v33 = vld [vmem:[%s2059_s28 + $0x728] sm:$0xff]  ;;  %v488_v34 = vld [vmem:[%s2051_s5 + $0x730] sm:$0xff] }
 0x11c   : > { %v999_v32 = vmul.f32 %v2067_v2, %v742_v29  ;;  %v744_v35 = vld [vmem:[%s2059_s28 + $0x730] sm:$0xff]  ;;  %1506 = vst [vmem:[%s2089_s24 + $0x6f8] sm:$0xff] %v1250_v24  ;;  %v1253_v36 = vadd.f32 %v997_v26, %v484_v18  ;;  %v1000_v38 = vmul.f32 %v2067_v2, %v743_v33  ;;  %v489_v40 = vld [vmem:[%s2051_s5 + $0x738] sm:$0xff]  ;;  %v490_v42 = vld [vmem:[%s2051_s5 + $0x740] sm:$0xff] }
 0x11d   : > { %1507 = vst [vmem:[%s2089_s24 + $0x700] sm:$0xff] %v1251_v25  ;;  %v1254_v37 = vadd.f32 %v998_v27, %v485_v22  ;;  %v1001_v39 = vmul.f32 %v2067_v2, %v744_v35  ;;  %v745_v41 = vld [vmem:[%s2059_s28 + $0x738] sm:$0xff]  ;;  %1508 = vst [vmem:[%s2089_s24 + $0x708] sm:$0xff] %v1252_v31  ;;  %v746_v45 = vld [vmem:[%s2059_s28 + $0x740] sm:$0xff] }
 0x11e   : > { %v1255_v43 = vadd.f32 %v999_v32, %v486_v28  ;;  %v1002_v44 = vmul.f32 %v2067_v2, %v745_v41  ;;  %v491_v46 = vld [vmem:[%s2051_s5 + $0x748] sm:$0xff]  ;;  %1509 = vst [vmem:[%s2089_s24 + $0x710] sm:$0xff] %v1253_v36  ;;  %v1256_v48 = vadd.f32 %v1000_v38, %v487_v30  ;;  %v1003_v50 = vmul.f32 %v2067_v2, %v746_v45  ;;  %v492_v52 = vld [vmem:[%s2051_s5 + $0x750] sm:$0xff]  ;;  %v493_v54 = vld [vmem:[%s2051_s5 + $0x758] sm:$0xff] }
 0x11f   : > { %v747_v47 = vld [vmem:[%s2059_s28 + $0x748] sm:$0xff]  ;;  %1510 = vst [vmem:[%s2089_s24 + $0x718] sm:$0xff] %v1254_v37  ;;  %v1257_v49 = vadd.f32 %v1001_v39, %v488_v34  ;;  %v748_v53 = vld [vmem:[%s2059_s28 + $0x750] sm:$0xff]  ;;  %v749_v57 = vld [vmem:[%s2059_s28 + $0x758] sm:$0xff] }
 0x120   : > { %v1004_v51 = vmul.f32 %v2067_v2, %v747_v47  ;;  %1511 = vst [vmem:[%s2089_s24 + $0x720] sm:$0xff] %v1255_v43  ;;  %v1258_v55 = vadd.f32 %v1002_v44, %v489_v40  ;;  %v1005_v56 = vmul.f32 %v2067_v2, %v748_v53  ;;  %v494_v58 = vld [vmem:[%s2051_s5 + $0x760] sm:$0xff]  ;;  %1512 = vst [vmem:[%s2089_s24 + $0x728] sm:$0xff] %v1256_v48  ;;  %v495_v0 = vld [vmem:[%s2051_s5 + $0x768] sm:$0xff] }
 0x121   : > { %v750_v59 = vld [vmem:[%s2059_s28 + $0x760] sm:$0xff]  ;;  %1513 = vst [vmem:[%s2089_s24 + $0x730] sm:$0xff] %v1257_v49  ;;  %v1259_v60 = vadd.f32 %v1003_v50, %v490_v42  ;;  %v1006_v62 = vmul.f32 %v2067_v2, %v749_v57  ;;  %v751_v1 = vld [vmem:[%s2059_s28 + $0x768] sm:$0xff]  ;;  %v496_v3 = vld [vmem:[%s2051_s5 + $0x770] sm:$0xff] }
 0x122   : > { %v1260_v61 = vadd.f32 %v1004_v51, %v491_v46  ;;  %v1007_v63 = vmul.f32 %v2067_v2, %v750_v59  ;;  %1514 = vst [vmem:[%s2089_s24 + $0x738] sm:$0xff] %v1258_v55  ;;  %v1261_v4 = vadd.f32 %v1005_v56, %v492_v52  ;;  %v1008_v5 = vmul.f32 %v2067_v2, %v751_v1  ;;  %v752_v6 = vld [vmem:[%s2059_s28 + $0x770] sm:$0xff]  ;;  %v497_v7 = vld [vmem:[%s2051_s5 + $0x778] sm:$0xff]  ;;  %v498_v13 = vld [vmem:[%s2051_s5 + $0x780] sm:$0xff] }
 0x123   : > { %v753_v8 = vld [vmem:[%s2059_s28 + $0x778] sm:$0xff]  ;;  %1515 = vst [vmem:[%s2089_s24 + $0x740] sm:$0xff] %v1259_v60  ;;  %v1262_v9 = vadd.f32 %v1006_v62, %v493_v54  ;;  %v1009_v11 = vmul.f32 %v2067_v2, %v752_v6  ;;  %v754_v14 = vld [vmem:[%s2059_s28 + $0x780] sm:$0xff]  ;;  %v499_v15 = vld [vmem:[%s2051_s5 + $0x788] sm:$0xff] }
 0x124   : > { %1516 = vst [vmem:[%s2089_s24 + $0x748] sm:$0xff] %v1260_v61  ;;  %v1263_v10 = vadd.f32 %v1007_v63, %v494_v58  ;;  %v1010_v12 = vmul.f32 %v2067_v2, %v753_v8  ;;  %1517 = vst [vmem:[%s2089_s24 + $0x750] sm:$0xff] %v1261_v4  ;;  %v1264_v16 = vadd.f32 %v1008_v5, %v495_v0  ;;  %v755_v18 = vld [vmem:[%s2059_s28 + $0x788] sm:$0xff]  ;;  %v500_v19 = vld [vmem:[%s2051_s5 + $0x790] sm:$0xff] }
 0x125   : > { %v1011_v17 = vmul.f32 %v2067_v2, %v754_v14  ;;  %v756_v20 = vld [vmem:[%s2059_s28 + $0x790] sm:$0xff]  ;;  %1518 = vst [vmem:[%s2089_s24 + $0x758] sm:$0xff] %v1262_v9  ;;  %v1265_v21 = vadd.f32 %v1009_v11, %v496_v3  ;;  %v1012_v23 = vmul.f32 %v2067_v2, %v755_v18  ;;  %v501_v25 = vld [vmem:[%s2051_s5 + $0x798] sm:$0xff]  ;;  %v502_v27 = vld [vmem:[%s2051_s5 + $0x7a0] sm:$0xff] }
 0x126   : > { %1519 = vst [vmem:[%s2089_s24 + $0x760] sm:$0xff] %v1263_v10  ;;  %v1266_v22 = vadd.f32 %v1010_v12, %v497_v7  ;;  %v1013_v24 = vmul.f32 %v2067_v2, %v756_v20  ;;  %v757_v26 = vld [vmem:[%s2059_s28 + $0x798] sm:$0xff]  ;;  %1520 = vst [vmem:[%s2089_s24 + $0x768] sm:$0xff] %v1264_v16  ;;  %v758_v30 = vld [vmem:[%s2059_s28 + $0x7a0] sm:$0xff] }
 0x127   : > { %v1267_v28 = vadd.f32 %v1011_v17, %v498_v13  ;;  %v1014_v29 = vmul.f32 %v2067_v2, %v757_v26  ;;  %v503_v31 = vld [vmem:[%s2051_s5 + $0x7a8] sm:$0xff]  ;;  %1521 = vst [vmem:[%s2089_s24 + $0x770] sm:$0xff] %v1265_v21  ;;  %v1268_v33 = vadd.f32 %v1012_v23, %v499_v15  ;;  %v1015_v35 = vmul.f32 %v2067_v2, %v758_v30  ;;  %v504_v37 = vld [vmem:[%s2051_s5 + $0x7b0] sm:$0xff]  ;;  %v505_v39 = vld [vmem:[%s2051_s5 + $0x7b8] sm:$0xff] }
 0x128   : > { %v759_v32 = vld [vmem:[%s2059_s28 + $0x7a8] sm:$0xff]  ;;  %1522 = vst [vmem:[%s2089_s24 + $0x778] sm:$0xff] %v1266_v22  ;;  %v1269_v34 = vadd.f32 %v1013_v24, %v500_v19  ;;  %v760_v38 = vld [vmem:[%s2059_s28 + $0x7b0] sm:$0xff]  ;;  %v761_v42 = vld [vmem:[%s2059_s28 + $0x7b8] sm:$0xff] }
 0x129   : > { %v1016_v36 = vmul.f32 %v2067_v2, %v759_v32  ;;  %1523 = vst [vmem:[%s2089_s24 + $0x780] sm:$0xff] %v1267_v28  ;;  %v1270_v40 = vadd.f32 %v1014_v29, %v501_v25  ;;  %v1017_v41 = vmul.f32 %v2067_v2, %v760_v38  ;;  %v506_v43 = vld [vmem:[%s2051_s5 + $0x7c0] sm:$0xff]  ;;  %1524 = vst [vmem:[%s2089_s24 + $0x788] sm:$0xff] %v1268_v33  ;;  %v507_v49 = vld [vmem:[%s2051_s5 + $0x7c8] sm:$0xff] }
 0x12a   : > { %v762_v44 = vld [vmem:[%s2059_s28 + $0x7c0] sm:$0xff]  ;;  %1525 = vst [vmem:[%s2089_s24 + $0x790] sm:$0xff] %v1269_v34  ;;  %v1271_v45 = vadd.f32 %v1015_v35, %v502_v27  ;;  %v1018_v47 = vmul.f32 %v2067_v2, %v761_v42  ;;  %v763_v50 = vld [vmem:[%s2059_s28 + $0x7c8] sm:$0xff]  ;;  %v508_v51 = vld [vmem:[%s2051_s5 + $0x7d0] sm:$0xff] }
 0x12b   : > { %v1272_v46 = vadd.f32 %v1016_v36, %v503_v31  ;;  %v1019_v48 = vmul.f32 %v2067_v2, %v762_v44  ;;  %1526 = vst [vmem:[%s2089_s24 + $0x798] sm:$0xff] %v1270_v40  ;;  %v1273_v52 = vadd.f32 %v1017_v41, %v504_v37  ;;  %v1020_v53 = vmul.f32 %v2067_v2, %v763_v50  ;;  %v764_v54 = vld [vmem:[%s2059_s28 + $0x7d0] sm:$0xff]  ;;  %v509_v55 = vld [vmem:[%s2051_s5 + $0x7d8] sm:$0xff]  ;;  %v510_v61 = vld [vmem:[%s2051_s5 + $0x7e0] sm:$0xff] }
 0x12c   : > { %v765_v56 = vld [vmem:[%s2059_s28 + $0x7d8] sm:$0xff]  ;;  %1527 = vst [vmem:[%s2089_s24 + $0x7a0] sm:$0xff] %v1271_v45  ;;  %v1274_v57 = vadd.f32 %v1018_v47, %v505_v39  ;;  %v1021_v59 = vmul.f32 %v2067_v2, %v764_v54  ;;  %v766_v62 = vld [vmem:[%s2059_s28 + $0x7e0] sm:$0xff]  ;;  %v511_v63 = vld [vmem:[%s2051_s5 + $0x7e8] sm:$0xff] }
 0x12d   : > { %1528 = vst [vmem:[%s2089_s24 + $0x7a8] sm:$0xff] %v1272_v46  ;;  %v1275_v58 = vadd.f32 %v1019_v48, %v506_v43  ;;  %v1022_v60 = vmul.f32 %v2067_v2, %v765_v56  ;;  %1529 = vst [vmem:[%s2089_s24 + $0x7b0] sm:$0xff] %v1273_v52  ;;  %v1276_v0 = vadd.f32 %v1020_v53, %v507_v49  ;;  %v767_v3 = vld [vmem:[%s2059_s28 + $0x7e8] sm:$0xff]  ;;  %v512_v4 = vld [vmem:[%s2051_s5 + $0x7f0] sm:$0xff] }
 0x12e   : > { %v1023_v1 = vmul.f32 %v2067_v2, %v766_v62  ;;  %v768_v5 = vld [vmem:[%s2059_s28 + $0x7f0] sm:$0xff]  ;;  %1530 = vst [vmem:[%s2089_s24 + $0x7b8] sm:$0xff] %v1274_v57  ;;  %v1277_v6 = vadd.f32 %v1021_v59, %v508_v51  ;;  %v1024_v8 = vmul.f32 %v2067_v2, %v767_v3  ;;  %v513_v10 = vld [vmem:[%s2051_s5 + $0x7f8] sm:$0xff]  ;;  %1546 = sbr.rel (!%p3166_p6) target bundleno = 337 (0x151), region = 44 }
 0x12f   : > { %1531 = vst [vmem:[%s2089_s24 + $0x7c0] sm:$0xff] %v1275_v58  ;;  %v1278_v7 = vadd.f32 %v1022_v60, %v509_v55  ;;  %v1025_v9 = vmul.f32 %v2067_v2, %v768_v5  ;;  %v769_v11 = vld [vmem:[%s2059_s28 + $0x7f8] sm:$0xff]  ;;  %1532 = vst [vmem:[%s2089_s24 + $0x7c8] sm:$0xff] %v1276_v0 }
 0x130   : > { %v1279_v12 = vadd.f32 %v1023_v1, %v510_v61  ;;  %v1026_v13 = vmul.f32 %v2067_v2, %v769_v11  ;;  %1533 = vst [vmem:[%s2089_s24 + $0x7d0] sm:$0xff] %v1277_v6  ;;  %v1280_v14 = vadd.f32 %v1024_v8, %v511_v63 }
 0x131   : > { %1534 = vst [vmem:[%s2089_s24 + $0x7d8] sm:$0xff] %v1278_v7  ;;  %v1281_v15 = vadd.f32 %v1025_v9, %v512_v4 }
 0x132   : > { %1535 = vst [vmem:[%s2089_s24 + $0x7e0] sm:$0xff] %v1279_v12  ;;  %v1282_v16 = vadd.f32 %v1026_v13, %v513_v10  ;;  %1536 = vst [vmem:[%s2089_s24 + $0x7e8] sm:$0xff] %v1280_v14 }
 0x133   : > { %1537 = vst [vmem:[%s2089_s24 + $0x7f0] sm:$0xff] %v1281_v15 }
 0x134   : > { %1538 = vst [vmem:[%s2089_s24 + $0x7f8] sm:$0xff] %v1282_v16 }
 0x135   : > { %s3178_s8 = smov (!%p1549_p5, %s1548_s8), 256 }
 0x136   : > { %s3098_s9 = sshll.u32 %s3178_s8, 7 }
 0x137   : > { %s1553_s10 = ssub.s32 32768, %s3098_s9 }
 0x138   : > { %1554 = vsyncadd %s1540_s29, %s1553_s10  ;;  %p1679_p1 = scmp.ne.s32.totalorder %s3098_s9, 0  ;;  %s1687_s25 = sshll.u32 %s1915_s0, 15 }
 0x139   : > { %s3108_s20 = scalar_lea.hbm %s3160_s3, %s1687_s25  ;;  %s1559_s27 = sshll.u32 %s2089_s24, 4  ;;  %s3111_s27 = int_to_ptr.vmem [resolvable:$true] %s1559_s27 }
 0x13a   : > { %s1790_s4 = scalar_lea.vmem %s3111_s27, %s3098_s9  ;;  %s1868_s23 = smov [#allocation8]  }
 0x13b   : > { %p1791_p3 = scmp.ne.s32.totalorder %s3111_s27, %s1790_s4  ;;  %s1794_s11 = sshll.u32 %s1868_s23, 4  ;;  %s1795_s11 = int_to_ptr.vmem [resolvable:$false] %s1794_s11 }
 0x13c   : > { %s1796_s0 = scalar_lea.vmem %s1795_s11, 65536  ;;  %p1797_p9 = scmp.lt.s32.totalorder %s3111_s27, %s1795_s11 }
 0x13d   : > { %p1792_p4 = pnand %p1791_p3, %p1679_p1  ;;  %p1798_p10 = scmp.lt.s32.totalorder %s1796_s0, %s1790_s4 }
 0x13f   : > { %p1793_p7 = pneg %p1792_p4  ;;  %p1799_p11 = por %p1798_p10, %p1797_p9 }
 0x141   : > { %p1800_p2 = pnand %p1799_p11, %p1793_p7 }
 0x143   : > { %1803 = shalt.err (!%p1800_p2)
}
 0x144   : > { %s1804_s30 = scalar_lea.hbm %s3108_s20, %s3098_s9  ;;  %s1808_s28 = scalar_lea.hbm %s3160_s3, 33664 }
 0x145   : > { %p1805_p8 = scmp.ne.s32.totalorder %s3108_s20, %s1804_s30  ;;  %p1809_p0 = scmp.lt.u32.totalorder %s3108_s20, %s3160_s3 }
 0x146   : > { %p1810_p6 = scmp.lt.u32.totalorder %s1808_s28, %s1804_s30  ;;  %p1812_p3 = scmp.lt.u32.totalorder %s1804_s30, %s3108_s20 }
 0x147   : > { %p1806_p13 = pnand %p1805_p8, %p1679_p1 }
 0x148   : > { %p1811_p5 = por %p1810_p6, %p1809_p0 }
 0x149   : > { %p1807_p12 = pneg %p1806_p13 }
 0x14a   : > { %p1813_p4 = por %p1812_p3, %p1811_p5 }
 0x14c   : > { %p1814_p7 = pnand %p1813_p4, %p1807_p12 }
 0x14e   : > { %1817 = shalt.err (!%p1814_p7)
}
 0x14f   : > { %s1869_s7 = smov 128   ;;  %s1870_s8 = smov 8  }
 0x150   : > { %1565 = dma.vmem_to_hbm [thread:$0]  (%p1679_p1), %s3111_s27, %s3098_s9, %s3108_s20, %s1540_s29, %s1869_s7, %s1869_s7, %s1870_s8  }
 0x151 PF: > { %s1574_s10 = sand.u32 1, %s1848_s14   ;;  %p3167_p9 = scmp.ne.s32.totalorder %s3165_s26, 0 }
 0x152   : > { %p3168_p10 = scmp.ge.s32.totalorder %s1860_s17, 2  ;;  %s1575_s25 = scalar_lea.sflag [#allocation5], %s1574_s10 }
 0x154   : > { %p1692_p11 = pnand %p3168_p10, %p3167_p9 }
 0x156   : > { %1843 = dma.done.wait (!%p1692_p11), %s1575_s25, 32768  }
 0x157   : > { %1845 = vsyncadd (!%p1692_p11), %s1575_s25, 4294934528  ;;  %p20_p2 = scmp.ge.s32.totalorder %s1919_s19, 4   ;;  %s3169_s14 = smov %s1852_s15 }
 0x158   : > { %s3170_s15 = smov %s1856_s16  ;;  %s3171_s16 = smov %s1931_s22 }
 0x159   : > { %s3172_s17 = smov %s1919_s19  ;;  %22 = sbr.rel (!%p20_p2) target bundleno = 9 (0x9), region = 90 }
 0x160   :  { %1580 = vsyncpa [#allocation4], 1 }
 0x161   :  { %1582 = vsyncpa [#allocation4 + $0x1], 1 }
 0x162   :  { %1583 = vsyncpa [#allocation7], 1 }
 0x163   :  { %1585 = vsyncpa [#allocation7 + $0x1], 1 }
 0x164   :  { %1586 = vsyncpa [#allocation5], 1 }
 0x165   :  { %1588 = vsyncpa [#allocation5 + $0x1], 1 }

</bundles_post_ra>
